<compile_context>
chip_gen: v5e
topology: v5e:2x2
jax: 0.10.0
libtpu: 0.0.40
codegen_flags: <defaults>
</compile_context>

<pallas_src>
import functools

import jax
import jax.numpy as jnp
from jax import lax
from jax.experimental import pallas as pl
from jax.experimental.pallas import tpu as pltpu


def _conv_bn_relu_kernel(x_ref, w_ref, scale_ref, shift_ref, o_ref,
                         *, kh, kw, sh, sw, toh, ow):
    # x_ref:     (Hp2, Wp, Cin)            one padded NHWC image, bf16
    # w_ref:     (KH*KW*Cin, TCout)        tap-major weight slab, bf16
    # scale_ref: (1, TCout)                gamma / sqrt(var + eps), f32
    # shift_ref: (1, TCout)                beta + (bias - mean) * scale, f32
    # o_ref:     (TOH, OW, TCout)          output row tile
    cin = x_ref.shape[-1]
    tcout = o_ref.shape[-1]
    r = pl.program_id(2)                                    # output-row block
    row0 = r * toh * sh
    if (toh * sh) % 8 == 0:
        row0 = pl.multiple_of(row0, 8)

    taps = []
    if sh == 1 and sw == 1:
        strip = x_ref[pl.ds(row0, toh + kh - 1)]            # (toh+kh-1, Wp, Cin)
        for i in range(kh):                                 # static, unrolled
            rows = strip[i:i + toh]                         # major-dim slice
            for j in range(kw):
                taps.append(rows[:, j:j + ow, :])           # (toh, ow, cin)
    else:
        # TODO(synk): stride>1 value stride-slice forces a relayout per tap;
        # a space-to-depth phase decomposition in the wrapper would avoid it.
        strip = x_ref[pl.ds(row0, (toh - 1) * sh + kh)]
        for i in range(kh):
            for j in range(kw):
                taps.append(strip[i:i + (toh - 1) * sh + 1:sh,
                                  j:j + (ow - 1) * sw + 1:sw, :])

    lhs = taps[0] if len(taps) == 1 else jnp.concatenate(taps, axis=-1)
    lhs = lhs.reshape(toh * ow, kh * kw * cin)              # (M, K) bf16
    acc = jnp.dot(lhs, w_ref[...],
                  preferred_element_type=jnp.float32)       # one MXU matmul
    y = jnp.maximum(acc * scale_ref[...] + shift_ref[...], 0.0)
    o_ref[...] = y.reshape(toh, ow, tcout).astype(o_ref.dtype)


def _pair(v):
    return tuple(v) if isinstance(v, (tuple, list)) else (int(v), int(v))


@functools.partial(jax.jit, static_argnames=("kernel_size", "stride", "padding"))
def basic_conv2d(x, weight, bias, gamma, beta, running_mean, running_var,
                 *, kernel_size, stride=1, padding=0, eps=1e-5):
    """Forward of BasicConv2d. x: (N, Cin, H, W) NCHW float. Returns NCHW."""
    n, cin, h, w = x.shape
    cout = weight.shape[0]
    kh, kw = _pair(kernel_size)
    sh, sw = _pair(stride)
    ph, pw = _pair(padding)
    oh = (h + 2 * ph - kh) // sh + 1
    ow = (w + 2 * pw - kw) // sw + 1
    hp, wp = h + 2 * ph, w + 2 * pw
    k_total = kh * kw * cin
    out_dtype = x.dtype
    out_itemsize = jnp.dtype(out_dtype).itemsize

    if bias is None:
        bias = jnp.zeros((cout,), jnp.float32)

    # ---- BN folding (scale applied in the f32 epilogue, not into weights) ----
    inv_std = lax.rsqrt(running_var.astype(jnp.float32) + eps)
    scale = (gamma * inv_std).astype(jnp.float32)                     # (Cout,)
    shift = (beta + (bias - running_mean) * scale).astype(jnp.float32)

    # ---- Cout tile: 256 matches v6e/v7x MXU N width, 128 for narrow layers ----
    tcout = 256 if cout >= 256 else 128
    cout_p = -(-cout // tcout) * tcout

    # OIHW -> (KH, KW, Cin, Cout) -> (KH*KW*Cin, Cout); tap-major rows match
    # the kernel's concat order.  Plain bf16 weights (no BN scale folded).
    w_mat = weight.transpose(2, 3, 1, 0).reshape(k_total, cout)
    w_mat = jnp.pad(w_mat, ((0, 0), (0, cout_p - cout))).astype(jnp.bfloat16)
    scale_p = jnp.pad(scale, (0, cout_p - cout)).reshape(1, cout_p)
    shift_p = jnp.pad(shift, (0, cout_p - cout)).reshape(1, cout_p)

    # ---- output-row tile: bound VMEM independent of image size ----
    toh = min(oh, max(1, 2048 // max(ow, 1)))
    div = next((c for c in range(toh, 0, -1) if oh % c == 0), 1)
    if div >= max(1, toh // 2):          # prefer a divisor (no padded rows)
        toh = div
    oh_p = -(-oh // toh) * toh
    n_row_blocks = oh_p // toh

    # Extra bottom zero rows so the last (padded) row block reads valid memory.
    hp2 = max(hp, (oh_p - 1) * sh + kh)
    extra = hp2 - hp

    # ---- input: NCHW -> NHWC, spatial pad (+ row padding), bf16 ----
    xp = jnp.pad(x.transpose(0, 2, 3, 1),
                 ((0, 0), (ph, ph + extra), (pw, pw), (0, 0))).astype(jnp.bfloat16)

    kernel = functools.partial(_conv_bn_relu_kernel,
                               kh=kh, kw=kw, sh=sh, sw=sw, toh=toh, ow=ow)

    # ---- VMEM / cost budgeting (generation-aware cap) ----
    blk_bytes = (2 * hp2 * wp * cin * 2                 # x image (bf16), 2 bufs
                 + 2 * k_total * tcout * 2              # weight slab, 2 bufs
                 + 2 * toh * ow * tcout * out_itemsize  # out tile, 2 bufs
                 + 3 * toh * ow * k_total * 2           # LHS concat temps (bf16)
                 + 2 * toh * ow * tcout * 4)            # f32 acc / epilogue
    try:
        phys_vmem = int(pltpu.get_tpu_info().vmem_capacity_bytes)
    except Exception:
        phys_vmem = 64 * 1024 * 1024                    # conservative (v7x)
    vmem_limit = int(min(int(phys_vmem * 0.75),
                         max(32 * 1024 * 1024, 2 * blk_bytes)))

    flops = 2 * n * oh_p * ow * k_total * cout_p
    bytes_accessed = (xp.size * 2 + w_mat.size * 2 + 2 * cout_p * 4
                      + n * oh_p * ow * cout_p * out_itemsize)

    out = pl.pallas_call(
        kernel,
        out_shape=jax.ShapeDtypeStruct((n, oh_p, ow, cout_p), out_dtype),
        grid_spec=pltpu.PrefetchScalarGridSpec(
            num_scalar_prefetch=0,
            # x block index constant over both inner axes -> image DMA'd once
            # per batch element; the small weight slab is the refetched operand.
            grid=(n, cout_p // tcout, n_row_blocks),
            in_specs=[
                pl.BlockSpec((None, hp2, wp, cin), lambda b, c, r: (b, 0, 0, 0)),
                pl.BlockSpec((k_total, tcout), lambda b, c, r: (0, c)),
                pl.BlockSpec((1, tcout), lambda b, c, r: (0, c)),
                pl.BlockSpec((1, tcout), lambda b, c, r: (0, c)),
            ],
            out_specs=pl.BlockSpec((None, toh, ow, tcout),
                                   lambda b, c, r: (b, r, 0, c)),
        ),
        compiler_params=pltpu.CompilerParams(
            dimension_semantics=("parallel", "parallel", "arbitrary"),
            vmem_limit_bytes=vmem_limit),
        cost_estimate=pl.CostEstimate(flops=flops, transcendentals=0,
                                      bytes_accessed=bytes_accessed),
    )(xp, w_mat, scale_p, shift_p)

    out = out[:, :oh, :, :cout]                  # drop row / Cout padding
    # Keep PyTorch's NCHW convention.  (Downstream consumers that accept NHWC
    # should drop this transpose and the one on the input for a full extra
    # HBM-pass saving.)
    return out.transpose(0, 3, 1, 2)


def _reference(x, weight, bias, gamma, beta, running_mean, running_var,
               *, stride, padding, eps=1e-5):
    y = lax.conv_general_dilated(
        x, weight, window_strides=(stride, stride),
        padding=[(padding, padding), (padding, padding)],
        dimension_numbers=("NCHW", "OIHW", "NCHW"))
    if bias is not None:
        y = y + bias.reshape(1, -1, 1, 1)
    inv_std = lax.rsqrt(running_var + eps).reshape(1, -1, 1, 1)
    y = (y - running_mean.reshape(1, -1, 1, 1)) * inv_std
    y = y * gamma.reshape(1, -1, 1, 1) + beta.reshape(1, -1, 1, 1)
    return jnp.maximum(y, 0.0)


if __name__ == "__main__":
    # Small shapes: batch=2, in_channels=4, out_channels=8, spatial=16, k=3, pad=1.
    N, CIN, COUT, H, W, KS, PAD = 2, 4, 8, 16, 16, 3, 1

    key = jax.random.PRNGKey(0)
    k1, k2, k3, k4, k5, k6 = jax.random.split(key, 6)
    x = jax.random.normal(k1, (N, CIN, H, W), dtype=jnp.float32)
    weight = jax.random.normal(k2, (COUT, CIN, KS, KS), dtype=jnp.float32) * 0.1
    bias = jax.random.normal(k3, (COUT,), dtype=jnp.float32) * 0.1
    gamma = 1.0 + 0.1 * jax.random.normal(k4, (COUT,), dtype=jnp.float32)
    beta = 0.1 * jax.random.normal(k5, (COUT,), dtype=jnp.float32)
    running_mean = 0.1 * jax.random.normal(k6, (COUT,), dtype=jnp.float32)
    running_var = jnp.ones((COUT,), dtype=jnp.float32)

    y = basic_conv2d(x, weight, bias, gamma, beta, running_mean, running_var,
                     kernel_size=KS, stride=1, padding=PAD)
    jax.block_until_ready(y)

    y_ref = _reference(x, weight, bias, gamma, beta, running_mean, running_var,
                       stride=1, padding=PAD)
    assert y.shape == (N, COUT, H, W), y.shape
    # bf16 MXU inputs (f32 accumulation, f32 BN epilogue): tolerance loosened
    # vs the f32 reference.
    assert jnp.allclose(y, y_ref, atol=5e-2, rtol=5e-2), (
        "mismatch vs reference, max abs err = %g"
        % float(jnp.max(jnp.abs(y - y_ref))))
    print("KERNEL_OK")
</pallas_src>

<mosaic_0001>
module attributes {stable_mosaic.version = 11 : i64} {
  func.func @_conv_bn_relu_kernel(%arg0: i32, %arg1: i32, %arg2: i32, %arg3: memref<1x18x18x4xbf16, #tpu.memory_space<vmem>>, %arg4: memref<36x128xbf16, #tpu.memory_space<vmem>>, %arg5: memref<1x128xf32, #tpu.memory_space<vmem>>, %arg6: memref<1x128xf32, #tpu.memory_space<vmem>>, %arg7: memref<1x16x16x128xf32, #tpu.memory_space<vmem>>) attributes {dimension_semantics = [#tpu.dimension_semantics<parallel>, #tpu.dimension_semantics<parallel>, #tpu.dimension_semantics<arbitrary>], iteration_bounds = array<i64: 2, 1, 1>, scalar_prefetch = 0 : i64, scratch_operands = 0 : i64, tpu.core_type = #tpu.core_type<tc>, window_params = [{transform_indices = @transform_0, window_bounds = array<i64: 1, 18, 18, 4>}, {transform_indices = @transform_1, window_bounds = array<i64: 36, 128>}, {transform_indices = @transform_2, window_bounds = array<i64: 1, 128>}, {transform_indices = @transform_3, window_bounds = array<i64: 1, 128>}, {transform_indices = @transform_4, window_bounds = array<i64: 1, 16, 16, 128>}]} {
    %c16_i32 = arith.constant 16 : i32
    %0 = arith.muli %arg2, %c16_i32 : i32
    %c1_i32 = arith.constant 1 : i32
    %1 = arith.muli %0, %c1_i32 : i32
    %2 = tpu.assume_multiple %1, 8 : i32
    %c0 = arith.constant 0 : index
    %3 = arith.index_cast %2 : i32 to index
    %c0_0 = arith.constant 0 : index
    %c0_1 = arith.constant 0 : index
    %4 = vector.load %arg3[%c0, %3, %c0_0, %c0_1] : memref<1x18x18x4xbf16, #tpu.memory_space<vmem>>, vector<1x18x18x4xbf16>
    %5 = vector.shape_cast %4 : vector<1x18x18x4xbf16> to vector<18x18x4xbf16>
    %6 = vector.extract_strided_slice %5 {offsets = [0, 0, 0], sizes = [16, 18, 4], strides = [1, 1, 1]} : vector<18x18x4xbf16> to vector<16x18x4xbf16>
    %7 = vector.extract_strided_slice %6 {offsets = [0, 0, 0], sizes = [16, 16, 4], strides = [1, 1, 1]} : vector<16x18x4xbf16> to vector<16x16x4xbf16>
    %8 = vector.extract_strided_slice %6 {offsets = [0, 1, 0], sizes = [16, 16, 4], strides = [1, 1, 1]} : vector<16x18x4xbf16> to vector<16x16x4xbf16>
    %9 = vector.extract_strided_slice %6 {offsets = [0, 2, 0], sizes = [16, 16, 4], strides = [1, 1, 1]} : vector<16x18x4xbf16> to vector<16x16x4xbf16>
    %10 = vector.extract_strided_slice %5 {offsets = [1, 0, 0], sizes = [16, 18, 4], strides = [1, 1, 1]} : vector<18x18x4xbf16> to vector<16x18x4xbf16>
    %11 = vector.extract_strided_slice %10 {offsets = [0, 0, 0], sizes = [16, 16, 4], strides = [1, 1, 1]} : vector<16x18x4xbf16> to vector<16x16x4xbf16>
    %12 = vector.extract_strided_slice %10 {offsets = [0, 1, 0], sizes = [16, 16, 4], strides = [1, 1, 1]} : vector<16x18x4xbf16> to vector<16x16x4xbf16>
    %13 = vector.extract_strided_slice %10 {offsets = [0, 2, 0], sizes = [16, 16, 4], strides = [1, 1, 1]} : vector<16x18x4xbf16> to vector<16x16x4xbf16>
    %14 = vector.extract_strided_slice %5 {offsets = [2, 0, 0], sizes = [16, 18, 4], strides = [1, 1, 1]} : vector<18x18x4xbf16> to vector<16x18x4xbf16>
    %15 = vector.extract_strided_slice %14 {offsets = [0, 0, 0], sizes = [16, 16, 4], strides = [1, 1, 1]} : vector<16x18x4xbf16> to vector<16x16x4xbf16>
    %16 = vector.extract_strided_slice %14 {offsets = [0, 1, 0], sizes = [16, 16, 4], strides = [1, 1, 1]} : vector<16x18x4xbf16> to vector<16x16x4xbf16>
    %17 = vector.extract_strided_slice %14 {offsets = [0, 2, 0], sizes = [16, 16, 4], strides = [1, 1, 1]} : vector<16x18x4xbf16> to vector<16x16x4xbf16>
    %18 = tpu.concatenate %7, %8, %9, %11, %12, %13, %15, %16, %17 in 2 : vector<16x16x4xbf16>, vector<16x16x4xbf16>, vector<16x16x4xbf16>, vector<16x16x4xbf16>, vector<16x16x4xbf16>, vector<16x16x4xbf16>, vector<16x16x4xbf16>, vector<16x16x4xbf16>, vector<16x16x4xbf16> -> vector<16x16x36xbf16>
    %19 = vector.shape_cast %18 : vector<16x16x36xbf16> to vector<256x36xbf16>
    %c0_2 = arith.constant 0 : index
    %c0_3 = arith.constant 0 : index
    %20 = vector.load %arg4[%c0_2, %c0_3] : memref<36x128xbf16, #tpu.memory_space<vmem>>, vector<36x128xbf16>
    %cst = arith.constant dense<0.000000e+00> : vector<256x128xf32>
    %21 = tpu.matmul %19, %20, %cst {dimension_numbers = #tpu.dot_dimension_numbers<[1], [0], [0], [1], [0, 0, 1, 1], [], []>} : vector<256x36xbf16>, vector<36x128xbf16>, vector<256x128xf32> -> vector<256x128xf32>
    %c0_4 = arith.constant 0 : index
    %c0_5 = arith.constant 0 : index
    %22 = vector.load %arg5[%c0_4, %c0_5] : memref<1x128xf32, #tpu.memory_space<vmem>>, vector<1x128xf32>
    %23 = vector.broadcast %22 : vector<1x128xf32> to vector<256x128xf32>
    %24 = arith.mulf %21, %23 : vector<256x128xf32>
    %c0_6 = arith.constant 0 : index
    %c0_7 = arith.constant 0 : index
    %25 = vector.load %arg6[%c0_6, %c0_7] : memref<1x128xf32, #tpu.memory_space<vmem>>, vector<1x128xf32>
    %26 = vector.broadcast %25 : vector<1x128xf32> to vector<256x128xf32>
    %27 = arith.addf %24, %26 : vector<256x128xf32>
    %cst_8 = arith.constant 0.000000e+00 : f32
    %28 = vector.broadcast %cst_8 : f32 to vector<256x128xf32>
    %29 = arith.maximumf %27, %28 : vector<256x128xf32>
    %30 = vector.shape_cast %29 : vector<256x128xf32> to vector<16x16x128xf32>
    %c0_9 = arith.constant 0 : index
    %c0_10 = arith.constant 0 : index
    %c0_11 = arith.constant 0 : index
    %c0_12 = arith.constant 0 : index
    %31 = vector.load %arg7[%c0_9, %c0_10, %c0_11, %c0_12] : memref<1x16x16x128xf32, #tpu.memory_space<vmem>>, vector<1x16x16x128xf32>
    %32 = vector.shape_cast %31 : vector<1x16x16x128xf32> to vector<16x16x128xf32>
    %33 = vector.shape_cast %30 : vector<16x16x128xf32> to vector<1x16x16x128xf32>
    tpu.vector_store %arg7[%c0_9, %c0_10, %c0_11, %c0_12], %33 {strides = array<i32>} : memref<1x16x16x128xf32, #tpu.memory_space<vmem>>, vector<1x16x16x128xf32>,
    return
  }
  func.func @transform_0(%arg0: i32, %arg1: i32, %arg2: i32) -> (i32, i32, i32, i32) {
    %c0_i32 = arith.constant 0 : i32
    %c0_i32_0 = arith.constant 0 : i32
    %c0_i32_1 = arith.constant 0 : i32
    %c0_i32_2 = arith.constant 0 : i32
    return %arg0, %c0_i32, %c0_i32_0, %c0_i32_1 : i32, i32, i32, i32
  }
  func.func @transform_1(%arg0: i32, %arg1: i32, %arg2: i32) -> (i32, i32) {
    %c0_i32 = arith.constant 0 : i32
    %c0_i32_0 = arith.constant 0 : i32
    return %c0_i32, %arg1 : i32, i32
  }
  func.func @transform_2(%arg0: i32, %arg1: i32, %arg2: i32) -> (i32, i32) {
    %c0_i32 = arith.constant 0 : i32
    %c0_i32_0 = arith.constant 0 : i32
    return %c0_i32, %arg1 : i32, i32
  }
  func.func @transform_3(%arg0: i32, %arg1: i32, %arg2: i32) -> (i32, i32) {
    %c0_i32 = arith.constant 0 : i32
    %c0_i32_0 = arith.constant 0 : i32
    return %c0_i32, %arg1 : i32, i32
  }
  func.func @transform_4(%arg0: i32, %arg1: i32, %arg2: i32) -> (i32, i32, i32, i32) {
    %c0_i32 = arith.constant 0 : i32
    %c0_i32_0 = arith.constant 0 : i32
    return %arg0, %arg2, %c0_i32, %arg1 : i32, i32, i32, i32
  }
}

</mosaic_0001>

<bundles_post_ra>
// kernel: basic_conv2d.1
= control target key start
LH: loop header
LB: loop body
LE: loop exit
PB: predicated region body
PF: predicated region fallthrough
CT: control target
= control target key end

     0   :  { %s1933_s15 = smov 0   ;;  %s1935_s16 = smov 0   ;;  %s2862_s0 = inlined_call_operand.vmem [shape: bf16[2,18,18,4], index: 0, kind: input, shape index: {}]   ;;  %s2863_s1 = inlined_call_operand.vmem [shape: bf16[36,128], index: 1, kind: input, shape index: {}]   ;;  %s2864_s2 = inlined_call_operand.vmem [shape: f32[1,128], index: 2, kind: input, shape index: {}]   ;;  %s2865_s3 = inlined_call_operand.vmem [shape: f32[1,128], index: 3, kind: input, shape index: {}]   ;;  %s2866_s4 = inlined_call_operand.vmem [shape: f32[2,16,16,128], index: 4, kind: output, shape index: {}]  }
   0x1   :  { %s1937_s17 = smov 0  }
   0x2 LB: > { %s33_s18 = sadd.s32 1, %s1894_s16  ;;  %p1708_p0 = scmp.ge.s32.totalorder %s1898_s17, 1  ;;  %s1898_s17 = sphi %s1937_s17, %s14_s17   ;;  %s1894_s16 = sphi %s1935_s16, %s2880_s16   ;;  %s1890_s15 = sphi %s1933_s15, %s2879_s15  }
   0x3   : > { %p35_p1 = scmp.ge.s32.totalorder %s33_s18, 2  ;;  %p210_p2 = scmp.lt.s32.totalorder %s1898_s17, 3 }
   0x5   : > { %s2882_s18 = smov (%p35_p1, %s33_s18), 0  ;;  %p211_p3 = pnand %p1708_p0, %p210_p2 }
   0x7   : > { %214 = sbr.rel (%p211_p3) target bundleno = 622 (0x26e), region = 36 }
   0xc   : > { %p254_p4 = scmp.lt.s32.totalorder %s1890_s15, 1  ;;  %vm470_vm0 = vsmask.f32 7424  ;;  %s1900_s23 = smov 4   ;;  %vm695_vm1 = vcmask 1046528   ;;  %vm1047_vm2 = vcmask 64512  }
   0xd   : > { %s1901_s24 = smov 8   ;;  %s1902_s25 = smov 12   ;;  %vm1014_vm3 = vcmask 31744   ;;  %vm1080_vm4 = vcmask 97280   ;;  %vm1331_vm5 = vcmask 1041408   ;;  %vm1113_vm6 = vcmask 130048  }
   0xe   : > { %s2884_s15 = smov (!%p254_p4, %s1890_s15), 1  ;;  %s1903_s26 = smov 16   ;;  %vm1146_vm7 = vcmask 162816   ;;  %vm1179_vm8 = vcmask 195584   ;;  %vm1212_vm9 = vcmask 228352   ;;  %vm1245_vm10 = vcmask 261120  }
   0xf   : > { %s1840_s19 = smul.u32 216, %s2884_s15  ;;  %s1904_s27 = smov 24   ;;  %vm1298_vm11 = vcmask 293888  }
  0x10   : > { %s1905_s28 = smov 20   ;;  %s1906_s29 = smov 28  }
  0x11   : > { %s1957_s22 = scalar_lea.vmem %s2862_s0, %s1840_s19  ;;  %s1907_s30 = smov 32  }
  0x12   : > { %v1960_v0 = vld [vmem:[%s1957_s22 + $0x30] sm:$0xff]  ;;  %v302_v1 = vld [vmem:[%s1957_s22 + $0x38] sm:$0x1]  ;;  %v296_v4 = vld [vmem:[%s1957_s22 + $0x20] sm:$0x1]  ;;  %s1810_s19 = sshll.u32 %s2884_s15, 8 }
  0x13   : > { %v1964_v2 = vld [vmem:[%s1957_s22 + $0x18] sm:$0xff]  ;;  %v442_v3 = vunpack.c.l.b16 %v302_v1  ;;  %v1968_v5 = vld [vmem:[%s1957_s22] sm:$0xff]  ;;  %v290_v6 = vld [vmem:[%s1957_s22 + $0x8] sm:$0x1]  ;;  %v520_v7 = vshrl.u32 %v1960_v0, 16  ;;  %v522_v8 = vshll.u32 %v1960_v0, 16  ;;  %v440_v9 = vunpack.c.l.b16 %v296_v4 }
  0x14   : > { %v496_v10 = vshrl.u32 %v1964_v2, 16  ;;  %v305_v11 = vld [vmem:[%s1957_s22 + $0x44] sm:$0x1]  ;;  %v498_v13 = vshll.u32 %v1964_v2, 16  ;;  %v438_v14 = vunpack.c.l.b16 %v290_v6  ;;  %v472_v15 = vshrl.u32 %v1968_v5, 16  ;;  %v1980_v16 = vld [vmem:[%s1957_s22 + $0x3c] sm:$0xff] }
  0x15   : > { %v1975_v12 = vpack.c.b16 %v442_v3, %v442_v3  ;;  %v524_v17 = vrot.slane %v522_v8, 1  ;;  %v1982_v18 = vpack.c.b16 %v440_v9, %v440_v9  ;;  %v474_v19 = vshll.u32 %v1968_v5, 16  ;;  %v299_v25 = vld [vmem:[%s1957_s22 + $0x2c] sm:$0x1]  ;;  %v1994_v30 = vld [vmem:[%s1957_s22 + $0x24] sm:$0xff]  ;;  %v2027_v59 = vld [vmem:[%s1957_s22 + $0x54] sm:$0xff] }
  0x16   : > { %v443_v20 = vunpack.c.l.b16 %v305_v11  ;;  %v500_v22 = vrot.slane %v498_v13, 1  ;;  %v1986_v23 = vpack.c.b16 %v438_v14, %v438_v14  ;;  %v532_v24 = vshrl.u32 %v1980_v16, 16  ;;  %v2000_v39 = vld [vmem:[%s1957_s22 + $0xc] sm:$0xff]  ;;  %v293_v40 = vld [vmem:[%s1957_s22 + $0x14] sm:$0x1]  ;;  %v2008_v45 = vld [vmem:[%s1957_s22 + $0x60] sm:$0xff] }
  0x17   : > { %v527_v21 = vshll.u32 %v1975_v12, 16  ;;  %v525_v26 = vor.u32 %v524_v17, %v520_v7  ;;  %v503_v27 = vshll.u32 %v1982_v18, 16  ;;  %v476_v28 = vrot.slane %v474_v19, 1  ;;  %v314_v46 = vld [vmem:[%s1957_s22 + $0x68] sm:$0x1] }
  0x18   : > { %v1991_v29 = vpack.c.b16 %v443_v20, %v443_v20  ;;  %v501_v32 = vor.u32 %v500_v22, %v496_v10  ;;  %v479_v33 = vshll.u32 %v1986_v23, 16  ;;  %v534_v34 = vshll.u32 %v1980_v16, 16  ;;  %v311_v60 = vld [vmem:[%s1957_s22 + $0x5c] sm:$0x1]  ;;  %v2040_v8 = vld [vmem:[%s1957_s22 + $0x48] sm:$0xff] }
  0x19   : > { %v529_v31 = vrot.slane %v527_v21, 1  ;;  %v505_v35 = vrot.slane %v503_v27, 1  ;;  %v477_v36 = vor.u32 %v476_v28, %v472_v15  ;;  %v441_v38 = vunpack.c.l.b16 %v299_v25  ;;  %v308_v9 = vld [vmem:[%s1957_s22 + $0x50] sm:$0x1]  ;;  %v323_v21 = vld [vmem:[%s1957_s22 + $0x8c] sm:$0x1] }
  0x1a   : > { %v539_v37 = vshll.u32 %v1991_v29, 16  ;;  %v481_v42 = vrot.slane %v479_v33, 1  ;;  %v536_v43 = vrot.slane %v534_v34, 1  ;;  %v508_v44 = vshrl.u32 %v1994_v30, 16  ;;  %v2054_v27 = vld [vmem:[%s1957_s22 + $0x84] sm:$0xff]  ;;  %v2061_v34 = vld [vmem:[%s1957_s22 + $0x78] sm:$0xff] }
  0x1b   : > { %v2004_v41 = vsel %vm470_vm0, %v525_v26, %v529_v31  ;;  %v2014_v47 = vsel %vm470_vm0, %v501_v32, %v505_v35  ;;  %v2016_v49 = vpack.c.b16 %v441_v38, %v441_v38  ;;  %v510_v50 = vshll.u32 %v1994_v30, 16 }
  0x1c   : > { %671 = vrot.lane.b32.xlu2 %v2004_v41, %s1900_s23  ;;  %v541_v48 = vrot.slane %v539_v37, 1  ;;  %667 = vrot.lane.b32.xlu1 %v2014_v47, %s1900_s23  ;;  %v482_v51 = vsel %vm470_vm0, %v477_v36, %v481_v42  ;;  %v537_v52 = vor.u32 %v536_v43, %v532_v24  ;;  %v439_v53 = vunpack.c.l.b16 %v293_v40  ;;  %v320_v40 = vld [vmem:[%s1957_s22 + $0x80] sm:$0x1] }
  0x1d   : > { %v484_v54 = vshrl.u32 %v2000_v39, 16  ;;  %663 = vrot.lane.b32.xlu0 %v482_v51, %s1900_s23  ;;  %v512_v55 = vrot.slane %v510_v50, 1  ;;  %v515_v56 = vshll.u32 %v2016_v49, 16  ;;  %v486_v57 = vshll.u32 %v2000_v39, 16 }
  0x1e   : > { %v446_v58 = vunpack.c.l.b16 %v314_v46  ;;  %v2031_v61 = vsel %vm470_vm0, %v537_v52, %v541_v48  ;;  %v2033_v62 = vpack.c.b16 %v439_v53, %v439_v53  ;;  %v568_v63 = vshrl.u32 %v2008_v45, 16  ;;  %v2080_v52 = vld [vmem:[%s1957_s22 + $0x6c] sm:$0xff]  ;;  %v317_v53 = vld [vmem:[%s1957_s22 + $0x74] sm:$0x1] }
  0x1f   : > { %2871 = vst [vmem:[#allocation2_spill] sm:$0xff] %v2031_v61  ;;  %v570_v1 = vshll.u32 %v2008_v45, 16  ;;  %v513_v3 = vor.u32 %v512_v55, %v508_v44  ;;  %v517_v4 = vrot.slane %v515_v56, 1  ;;  %v488_v6 = vrot.slane %v486_v57, 1 }
  0x20   : > { %v2037_v7 = vpack.c.b16 %v446_v58, %v446_v58  ;;  %v491_v10 = vshll.u32 %v2033_v62, 16  ;;  %v445_v13 = vunpack.c.l.b16 %v311_v60  ;;  %v556_v14 = vshrl.u32 %v2027_v59, 16  ;;  %v2088_v58 = vld [vmem:[%s1957_s22 + $0xa8] sm:$0xff] }
  0x21   : > { %v572_v11 = vrot.slane %v570_v1, 1  ;;  %v2046_v15 = vsel %vm470_vm0, %v513_v3, %v517_v4  ;;  %v489_v17 = vor.u32 %v488_v6, %v484_v54  ;;  %v558_v20 = vshll.u32 %v2027_v59, 16  ;;  %v332_v4 = vld [vmem:[%s1957_s22 + $0xb0] sm:$0x1] }
  0x22   : > { %v575_v19 = vshll.u32 %v2037_v7, 16  ;;  %v493_v22 = vrot.slane %v491_v10, 1  ;;  %v2051_v25 = vpack.c.b16 %v445_v13, %v445_v13  ;;  %v444_v26 = vunpack.c.l.b16 %v308_v9 }
  0x23   : > { %v573_v24 = vor.u32 %v572_v11, %v568_v63  ;;  %v560_v31 = vrot.slane %v558_v20, 1  ;;  %v544_v32 = vshrl.u32 %v2040_v8, 16  ;;  %v546_v33 = vshll.u32 %v2040_v8, 16  ;;  %v2104_v20 = vld [vmem:[%s1957_s22 + $0x9c] sm:$0xff] }
  0x24   : > { %673 = vrot.lane.b32.xlu2 %v2031_v61, %s1900_s23  ;;  %v577_v28 = vrot.slane %v575_v19, 1  ;;  %669 = vrot.lane.b32.xlu1 %v2046_v15, %s1900_s23  ;;  %v2066_v35 = vsel %vm470_vm0, %v489_v17, %v493_v22  ;;  %v563_v36 = vshll.u32 %v2051_v25, 16  ;;  %v2069_v37 = vpack.c.b16 %v444_v26, %v444_v26 }
  0x25   : > { %v449_v38 = vunpack.c.l.b16 %v323_v21  ;;  %665 = vrot.lane.b32.xlu0 %v2066_v35, %s1900_s23  ;;  %v561_v42 = vor.u32 %v560_v31, %v556_v14  ;;  %v548_v43 = vrot.slane %v546_v33, 1  ;;  %v604_v44 = vshrl.u32 %v2054_v27, 16  ;;  %v329_v21 = vld [vmem:[%s1957_s22 + $0xa4] sm:$0x1] }
  0x26   : > { %v565_v46 = vrot.slane %v563_v36, 1  ;;  %v551_v48 = vshll.u32 %v2069_v37, 16  ;;  %v606_v51 = vshll.u32 %v2054_v27, 16  ;;  %v2084_v54 = vsel %vm470_vm0, %v573_v24, %v577_v28 }
  0x27   : > { %v2076_v50 = vpack.c.b16 %v449_v38, %v449_v38  ;;  %v549_v55 = vor.u32 %v548_v43, %v544_v32  ;;  %v448_v56 = vunpack.c.l.b16 %v320_v40  ;;  %v594_v57 = vshll.u32 %v2061_v34, 16  ;;  %v2121_v43 = vld [vmem:[%s1957_s22 + $0x90] sm:$0xff] }
  0x28   : > { %v553_v60 = vrot.slane %v551_v48, 1  ;;  %v608_v63 = vrot.slane %v606_v51, 1  ;;  %v592_v3 = vshrl.u32 %v2061_v34, 16  ;;  %v2094_v6 = vsel %vm470_vm0, %v561_v42, %v565_v46 }
  0x29   : > { %v611_v1 = vshll.u32 %v2076_v50, 16  ;;  %v2096_v9 = vpack.c.b16 %v448_v56, %v448_v56  ;;  %v596_v10 = vrot.slane %v594_v57, 1  ;;  %v447_v11 = vunpack.c.l.b16 %v317_v53 }
  0x2a   : > { %v2099_v13 = vsel %vm470_vm0, %v549_v55, %v553_v60  ;;  %v609_v14 = vor.u32 %v608_v63, %v604_v44  ;;  %v580_v17 = vshrl.u32 %v2080_v52, 16  ;;  %v582_v19 = vshll.u32 %v2080_v52, 16  ;;  %v326_v44 = vld [vmem:[%s1957_s22 + $0x98] sm:$0x1] }
  0x2b   : > { %v613_v22 = vrot.slane %v611_v1, 1  ;;  %v599_v24 = vshll.u32 %v2096_v9, 16  ;;  %v2110_v26 = vpack.c.b16 %v447_v11, %v447_v11  ;;  %v452_v28 = vunpack.c.l.b16 %v332_v4 }
  0x2c   : > { %679 = vrot.lane.b32.xlu2 %v2084_v54, %s1900_s23  ;;  %677 = vrot.lane.b32.xlu1 %v2094_v6, %s1900_s23  ;;  %v597_v31 = vor.u32 %v596_v10, %v592_v3  ;;  %v584_v32 = vrot.slane %v582_v19, 1  ;;  %v642_v33 = vshll.u32 %v2088_v58, 16  ;;  %v451_v42 = vunpack.c.l.b16 %v329_v21 }
  0x2d   : > { %675 = vrot.lane.b32.xlu0 %v2099_v13, %s1900_s23  ;;  %v601_v36 = vrot.slane %v599_v24, 1  ;;  %v587_v38 = vshll.u32 %v2110_v26, 16  ;;  %v2118_v40 = vpack.c.b16 %v452_v28, %v452_v28  ;;  %v630_v48 = vshll.u32 %v2104_v20, 16 }
  0x2e   : > { %v585_v46 = vor.u32 %v584_v32, %v580_v17  ;;  %v2126_v51 = vsel %vm470_vm0, %v609_v14, %v613_v22  ;;  %v640_v55 = vshrl.u32 %v2088_v58, 16  ;;  %v2129_v56 = vpack.c.b16 %v451_v42, %v451_v42  ;;  %v335_v14 = vld [vmem:[%s1957_s22 + $0xbc] sm:$0x1]  ;;  %v2146_v22 = vld [vmem:[%s1957_s22 + $0xb4] sm:$0xff] }
  0x2f   : > { %v589_v53 = vrot.slane %v587_v38, 1  ;;  %v644_v57 = vrot.slane %v642_v33, 1  ;;  %v647_v60 = vshll.u32 %v2118_v40, 16  ;;  %v628_v63 = vshrl.u32 %v2104_v20, 16 }
  0x30   : > { %v450_v1 = vunpack.c.l.b16 %v326_v44  ;;  %v2134_v3 = vsel %vm470_vm0, %v597_v31, %v601_v36  ;;  %v632_v4 = vrot.slane %v630_v48, 1  ;;  %v635_v10 = vshll.u32 %v2129_v56, 16 }
  0x31   : > { %v618_v11 = vshll.u32 %v2121_v43, 16  ;;  %v2140_v17 = vsel %vm470_vm0, %v585_v46, %v589_v53  ;;  %v616_v21 = vshrl.u32 %v2121_v43, 16  ;;  %v645_v28 = vor.u32 %v644_v57, %v640_v55 }
  0x32   : > { %2872 = vst [vmem:[#allocation3_spill] sm:$0xff] %v2140_v17  ;;  %v2142_v19 = vpack.c.b16 %v450_v1, %v450_v1  ;;  %v649_v31 = vrot.slane %v647_v60, 1  ;;  %v453_v33 = vunpack.c.l.b16 %v335_v14  ;;  %v633_v36 = vor.u32 %v632_v4, %v628_v63 }
  0x33   : > { %v620_v24 = vrot.slane %v618_v11, 1  ;;  %v637_v38 = vrot.slane %v635_v10, 1  ;;  %v654_v48 = vshll.u32 %v2146_v22, 16  ;;  %v652_v60 = vshrl.u32 %v2146_v22, 16 }
  0x34   : > { %685 = vrot.lane.b32.xlu2 %v2126_v51, %s1900_s23  ;;  %683 = vrot.lane.b32.xlu1 %v2134_v3, %s1900_s23  ;;  %v623_v32 = vshll.u32 %v2142_v19, 16  ;;  %v2155_v46 = vpack.c.b16 %v453_v33, %v453_v33  ;;  %v2159_v53 = vsel %vm470_vm0, %v645_v28, %v649_v31  ;;  %v699_v4 = vrot.slane %v2000_v39, 1 }
  0x35   : > { %681 = vrot.lane.b32.xlu0 %v2140_v17, %s1900_s23  ;;  %v621_v42 = vor.u32 %v620_v24, %v616_v21  ;;  %v2162_v55 = vsel %vm470_vm0, %v633_v36, %v637_v38  ;;  %v656_v1 = vrot.slane %v654_v48, 1  ;;  %v700_v10 = vrot.slane %v2033_v62, 1 }
  0x36   : > { %v625_v44 = vrot.slane %v623_v32, 1  ;;  %v659_v63 = vshll.u32 %v2155_v46, 16  ;;  %v696_v11 = vrot.slane %v1968_v5, 1  ;;  %v697_v14 = vrot.slane %v1986_v23, 1 }
  0x37   : > { %v657_v21 = vor.u32 %v656_v1, %v652_v60  ;;  %v2180_v28 = vsel %vm695_vm1, %v699_v4, %v700_v10  ;;  %v708_v62 = vrot.slane %v1960_v0, 1  ;;  %v709_v23 = vrot.slane %v1975_v12, 1 }
  0x38   : > { %v2165_v57 = vsel %vm470_vm0, %v621_v42, %v625_v44  ;;  %v661_v24 = vrot.slane %v659_v63, 1  ;;  %v698_v31 = vsel %vm695_vm1, %v696_v11, %v697_v14  ;;  %v705_v33 = vrot.slane %v1994_v30, 1 }
  0x39   : > { %v706_v36 = vrot.slane %v2016_v49, 1  ;;  %v702_v38 = vrot.slane %v1964_v2, 1  ;;  %v703_v42 = vrot.slane %v1982_v18, 1  ;;  %v2198_v44 = vsel %vm695_vm1, %v708_v62, %v709_v23 }
  0x3a   : > { %v2184_v32 = vsel %vm470_vm0, %v657_v21, %v661_v24  ;;  %v717_v12 = vrot.slane %v2027_v59, 1  ;;  %v718_v49 = vrot.slane %v2051_v25, 1  ;;  %v714_v18 = vrot.slane %v2040_v8, 1 }
  0x3b   : > { %v2201_v48 = vsel %vm695_vm1, %v705_v33, %v706_v36  ;;  %v2204_v60 = vsel %vm695_vm1, %v702_v38, %v703_v42  ;;  %v715_v1 = vrot.slane %v2069_v37, 1  ;;  %v711_v63 = vrot.slane %v1980_v16, 1 }
  0x3c   : > { %691 = vrot.lane.b32.xlu2 %v2159_v53, %s1900_s23  ;;  %689 = vrot.lane.b32.xlu1 %v2162_v55, %s1900_s23  ;;  %v712_v4 = vrot.slane %v1991_v29, 1  ;;  %v2219_v10 = vsel %vm695_vm1, %v717_v12, %v718_v49  ;;  %v726_v25 = vrot.slane %v2061_v34, 1  ;;  %v727_v37 = vrot.slane %v2096_v9, 1 }
  0x3d   : > { %687 = vrot.lane.b32.xlu0 %v2165_v57, %s1900_s23  ;;  %v2222_v11 = vsel %vm695_vm1, %v714_v18, %v715_v1  ;;  %v723_v29 = vrot.slane %v2080_v52, 1  ;;  %v724_v21 = vrot.slane %v2110_v26, 1  ;;  %v720_v24 = vrot.slane %v2008_v45, 1 }
  0x3e   : > { %v2225_v14 = vsel %vm695_vm1, %v711_v63, %v712_v4  ;;  %v2240_v62 = vsel %vm695_vm1, %v726_v25, %v727_v37  ;;  %v735_v9 = vrot.slane %v2104_v20, 1  ;;  %v736_v26 = vrot.slane %v2129_v56, 1 }
  0x3f   : > { %2873 = vst [vmem:[#allocation4_spill] sm:$0xff] %v2225_v14  ;;  %v2243_v23 = vsel %vm695_vm1, %v723_v29, %v724_v21  ;;  %v733_v36 = vrot.slane %v2142_v19, 1  ;;  %v729_v38 = vrot.slane %v2054_v27, 1  ;;  %v730_v42 = vrot.slane %v2076_v50, 1 }
  0x40   : > { %2874 = vst [vmem:[#allocation5_spill] sm:$0xff] %v2243_v23  ;;  %v2261_v12 = vsel %vm695_vm1, %v735_v9, %v736_v26  ;;  %v741_v50 = vrot.slane %v2146_v22, 1  ;;  %v742_v56 = vrot.slane %v2155_v46, 1  ;;  %v738_v19 = vrot.slane %v2088_v58, 1 }
  0x41   : > { %v2267_v18 = vsel %vm695_vm1, %v729_v38, %v730_v42  ;;  %v739_v1 = vrot.slane %v2118_v40, 1 }
  0x42   : > { %v2280_v63 = vsel %vm695_vm1, %v741_v50, %v742_v56 }
  0x43   : > { %v2283_v4 = vsel %vm695_vm1, %v738_v19, %v739_v1 }
  0x44   : > { %746 = vrot.lane.b32.xlu2 %v2180_v28, %s1901_s24  ;;  %744 = vrot.lane.b32.xlu1 %v698_v31, %s1901_s24  ;;  %v721_v31 = vrot.slane %v2037_v7, 1  ;;  %v732_v7 = vrot.slane %v2121_v43, 1 }
  0x45   : > { %693 = vrot.lane.b32.xlu0 %v2184_v32, %s1900_s23 }
  0x46   : > { %v2246_v33 = vsel %vm695_vm1, %v720_v24, %v721_v31  ;;  %v2264_v49 = vsel %vm695_vm1, %v732_v7, %v733_v36  ;;  %v2309_v24 = vld [vmem:[%s1957_s22 + $0xc0] sm:$0xff] }
  0x4c   : > { %752 = vrot.lane.b32.xlu2 %v2198_v44, %s1901_s24  ;;  %750 = vrot.lane.b32.xlu1 %v2201_v48, %s1901_s24 }
  0x4d   : > { %748 = vrot.lane.b32.xlu0 %v2204_v60, %s1901_s24 }
  0x54   : > { %758 = vrot.lane.b32.xlu2 %v2219_v10, %s1901_s24  ;;  %756 = vrot.lane.b32.xlu1 %v2222_v11, %s1901_s24 }
  0x55   : > { %754 = vrot.lane.b32.xlu0 %v2225_v14, %s1901_s24 }
  0x5c   : > { %764 = vrot.lane.b32.xlu2 %v2240_v62, %s1901_s24  ;;  %762 = vrot.lane.b32.xlu1 %v2243_v23, %s1901_s24 }
  0x5d   : > { %760 = vrot.lane.b32.xlu0 %v2246_v33, %s1901_s24 }
  0x64   : > { %770 = vrot.lane.b32.xlu2 %v2261_v12, %s1901_s24  ;;  %768 = vrot.lane.b32.xlu1 %v2264_v49, %s1901_s24 }
  0x65   : > { %766 = vrot.lane.b32.xlu0 %v2267_v18, %s1901_s24 }
  0x6c   : > { %781 = vrot.lane.b32.xlu2 %v2000_v39, %s1902_s25  ;;  %774 = vrot.lane.b32.xlu1 %v2280_v63, %s1901_s24 }
  0x6d   : > { %772 = vrot.lane.b32.xlu0 %v2283_v4, %s1901_s24 }
  0x74   : > { %787 = vrot.lane.b32.xlu2 %v1960_v0, %s1902_s25  ;;  %785 = vrot.lane.b32.xlu1 %v1994_v30, %s1902_s25 }
  0x75   : > { %783 = vrot.lane.b32.xlu0 %v1964_v2, %s1902_s25 }
  0x76   : > { %v672_v40 = vpop.permute.xlu2 %671 }
  0x7c   : > { %793 = vrot.lane.b32.xlu2 %v2027_v59, %s1902_s25  ;;  %791 = vrot.lane.b32.xlu1 %v2040_v8, %s1902_s25 }
  0x7d   : > { %789 = vrot.lane.b32.xlu0 %v1980_v16, %s1902_s25 }
  0x7e   : > { %v2296_v46 = vpop.permute.xlu2 %673 }
  0x84   : > { %799 = vrot.lane.b32.xlu2 %v2061_v34, %s1902_s25  ;;  %797 = vrot.lane.b32.xlu1 %v2080_v52, %s1902_s25 }
  0x85   : > { %795 = vrot.lane.b32.xlu0 %v2008_v45, %s1902_s25 }
  0x86   : > { %v2301_v25 = vpop.permute.xlu2 %679 }
  0x8c   : > { %805 = vrot.lane.b32.xlu2 %v2104_v20, %s1902_s25  ;;  %803 = vrot.lane.b32.xlu1 %v2121_v43, %s1902_s25 }
  0x8d   : > { %801 = vrot.lane.b32.xlu0 %v2054_v27, %s1902_s25 }
  0x8e   : > { %v2306_v37 = vpop.permute.xlu2 %685  ;;  %v668_v29 = vpop.permute.xlu1 %667 }
  0x8f   : > { %v664_v21 = vpop.permute.xlu0 %663 }
  0x94   : > { %811 = vrot.lane.b32.xlu2 %v2309_v24, %s1902_s25  ;;  %809 = vrot.lane.b32.xlu1 %v2146_v22, %s1902_s25 }
  0x95   : > { %807 = vrot.lane.b32.xlu0 %v2088_v58, %s1902_s25 }
  0x96   : > { %v2314_v31 = vpop.permute.xlu2 %691  ;;  %v670_v9 = vpop.permute.xlu1 %669 }
  0x97   : > { %v666_v26 = vpop.permute.xlu0 %665 }
  0x98   : > { %v1018_v7 = vsel %vm1014_vm3, %v2000_v39, %v666_v26  ;;  %v1024_v39 = vsel %vm1014_vm3, %v1960_v0, %v672_v40 }
  0x9c   : > { %852 = vrot.lane.b32.xlu2 %v2162_v55, %s1903_s26  ;;  %844 = vrot.lane.b32.xlu1 %v2140_v17, %s1903_s26 }
  0x9d   : > { %828 = vrot.lane.b32.xlu0 %v2066_v35, %s1903_s26 }
  0x9e   : > { %v747_v36 = vpop.permute.xlu2 %746  ;;  %v678_v38 = vpop.permute.xlu1 %677 }
  0x9f   : > { %v2325_v42 = vsel %vm1047_vm2, %v1018_v7, %v747_v36  ;;  %v676_v50 = vpop.permute.xlu0 %675  ;;  %v1030_v26 = vsel %vm1014_vm3, %v2027_v59, %v678_v38 }
  0xa4   : > { %916 = vrot.lane.b32.xlu2 %v2061_v34, %s1904_s27  ;;  %887 = vrot.lane.b32.xlu1 %v2261_v12, %s1905_s28 }
  0xa5   : > { %879 = vrot.lane.b32.xlu0 %v2243_v23, %s1905_s28  ;;  %v1016_v23 = vsel %vm1014_vm3, %v1968_v5, %v664_v21  ;;  %v1022_v21 = vsel %vm1014_vm3, %v1994_v30, %v670_v9  ;;  %v1028_v9 = vsel %vm1014_vm3, %v2040_v8, %v676_v50  ;;  %v1032_v50 = vsel %vm1014_vm3, %v2008_v45, %v2301_v25 }
  0xa6   : > { %v753_v35 = vpop.permute.xlu2 %752  ;;  %v684_v56 = vpop.permute.xlu1 %683 }
  0xa7   : > { %v2336_v19 = vsel %vm1047_vm2, %v1024_v39, %v753_v35  ;;  %v682_v1 = vpop.permute.xlu0 %681  ;;  %v1036_v35 = vsel %vm1014_vm3, %v2061_v34, %v684_v56 }
  0xac   : > { %971 = vrot.lane.b32.xlu2 %v2159_v53, %s1906_s29  ;;  %963 = vrot.lane.b32.xlu1 %v2134_v3, %s1906_s29 }
  0xad   : > { %924 = vrot.lane.b32.xlu0 %v2088_v58, %s1904_s27 }
  0xae   : > { %v759_v40 = vpop.permute.xlu2 %758  ;;  %v690_v7 = vpop.permute.xlu1 %689 }
  0xaf   : > { %v2347_v36 = vsel %vm1047_vm2, %v1030_v26, %v759_v40  ;;  %v688_v39 = vpop.permute.xlu0 %687  ;;  %v1042_v34 = vsel %vm1014_vm3, %v2104_v20, %v690_v7  ;;  %v1026_v7 = vsel %vm1014_vm3, %v1980_v16, %v2296_v46 }
  0xb4   : > { %836 = vrot.lane.b32.xlu2 %v2031_v61, %s1903_s26  ;;  %1006 = vrot.lane.b32.xlu1 %v2283_v4, %s1907_s30 }
  0xb5   : > { %998 = vrot.lane.b32.xlu0 %v2240_v62, %s1907_s30 }
  0xb6   : > { %v765_v38 = vpop.permute.xlu2 %764  ;;  %v745_v40 = vpop.permute.xlu1 %744 }
  0xb7   : > { %v2360_v26 = vsel %vm1047_vm2, %v1036_v35, %v765_v38  ;;  %v1049_v61 = vsel %vm1047_vm2, %v1016_v23, %v745_v40  ;;  %v694_v17 = vpop.permute.xlu0 %693  ;;  %v1020_v35 = vsel %vm1014_vm3, %v1964_v2, %v668_v29 }
  0xbc   : > { %900 = vrot.lane.b32.xlu2 %v1964_v2, %s1904_s27  ;;  %871 = vrot.lane.b32.xlu1 %v2225_v14, %s1905_s28 }
  0xbd   : > { %863 = vrot.lane.b32.xlu0 %v2180_v28, %s1905_s28 }
  0xbe   : > { %v771_v5 = vpop.permute.xlu2 %770  ;;  %v751_v23 = vpop.permute.xlu1 %750 }
  0xbf   : > { %v2374_v56 = vsel %vm1047_vm2, %v1042_v34, %v771_v5  ;;  %v1055_v38 = vsel %vm1047_vm2, %v1022_v21, %v751_v23  ;;  %v749_v40 = vpop.permute.xlu0 %748 }
  0xc0   : > { %v1053_v14 = vsel %vm1047_vm2, %v1020_v35, %v749_v40 }
  0xc4   : > { %955 = vrot.lane.b32.xlu2 %v2099_v13, %s1906_s29  ;;  %947 = vrot.lane.b32.xlu1 %v2014_v47, %s1906_s29 }
  0xc5   : > { %908 = vrot.lane.b32.xlu0 %v2040_v8, %s1904_s27  ;;  %v1034_v8 = vsel %vm1014_vm3, %v2080_v52, %v682_v1 }
  0xc6   : > { %v782_v28 = vpop.permute.xlu2 %781  ;;  %v757_v29 = vpop.permute.xlu1 %756 }
  0xc7   : > { %v2389_v2 = vsel %vm1080_vm4, %v1049_v61, %v782_v28  ;;  %v1061_v34 = vsel %vm1047_vm2, %v1028_v9, %v757_v29  ;;  %v755_v5 = vpop.permute.xlu0 %754  ;;  %v1038_v28 = vsel %vm1014_vm3, %v2054_v27, %v2306_v37 }
  0xc8   : > { %v1059_v21 = vsel %vm1047_vm2, %v1026_v7, %v755_v5  ;;  %v1044_v7 = vsel %vm1014_vm3, %v2088_v58, %v2314_v31 }
  0xcc   : > { %846 = vrot.lane.b32.xlu2 %v2134_v3, %s1903_s26  ;;  %990 = vrot.lane.b32.xlu1 %v2222_v11, %s1907_s30 }
  0xcd   : > { %982 = vrot.lane.b32.xlu0 %v2204_v60, %s1907_s30 }
  0xce   : > { %v788_v61 = vpop.permute.xlu2 %787  ;;  %v763_v46 = vpop.permute.xlu1 %762 }
  0xcf   : > { %v2405_v16 = vsel %vm1080_vm4, %v1055_v38, %v788_v61  ;;  %v1067_v3 = vsel %vm1047_vm2, %v1034_v8, %v763_v46  ;;  %v761_v23 = vpop.permute.xlu0 %760  ;;  %v1040_v38 = vsel %vm1014_vm3, %v2121_v43, %v688_v39  ;;  %v1046_v39 = vsel %vm1014_vm3, %v2146_v22, %v694_v17 }
  0xd0   : > { %v2412_v35 = vsel %vm1047_vm2, %v1032_v50, %v761_v23 }
  0xd4   : > { %889 = vrot.lane.b32.xlu2 %v2283_v4, %s1905_s28  ;;  %881 = vrot.lane.b32.xlu1 %v2240_v62, %s1905_s28 }
  0xd5   : > { %854 = vrot.lane.b32.xlu0 %v2159_v53, %s1903_s26 }
  0xd6   : > { %v794_v1 = vpop.permute.xlu2 %793  ;;  %v769_v40 = vpop.permute.xlu1 %768 }
  0xd7   : > { %v2423_v25 = vsel %vm1080_vm4, %v1061_v34, %v794_v1  ;;  %v2429_v4 = vsel %vm1047_vm2, %v1040_v38, %v769_v40  ;;  %v767_v9 = vpop.permute.xlu0 %766 }
  0xd8   : > { %v1071_v62 = vsel %vm1047_vm2, %v1038_v28, %v767_v9 }
  0xdc   : > { %965 = vrot.lane.b32.xlu2 %v2126_v51, %s1906_s29  ;;  %926 = vrot.lane.b32.xlu1 %v2146_v22, %s1904_s27 }
  0xdd   : > { %918 = vrot.lane.b32.xlu0 %v2054_v27, %s1904_s27 }
  0xde   : > { %v800_v53 = vpop.permute.xlu2 %799  ;;  %v775_v29 = vpop.permute.xlu1 %774 }
  0xdf   : > { %v2441_v37 = vsel %vm1080_vm4, %v1067_v3, %v800_v53  ;;  %v1079_v34 = vsel %vm1047_vm2, %v1046_v39, %v775_v29  ;;  %v773_v5 = vpop.permute.xlu0 %772  ;;  %v1830_v53 = vld [vmem:[%s2863_s1 + $0x8] sm:$0xff]  ;;  %v819_v39 = vshll.u32 %v2309_v24, 16 }
  0xe0   : > { %v1077_v61 = vsel %vm1047_vm2, %v1044_v7, %v773_v5  ;;  %v817_v5 = vshrl.u32 %v2309_v24, 16 }
  0xe4   : > { %1008 = vrot.lane.b32.xlu2 %v2280_v63, %s1907_s30  ;;  %1000 = vrot.lane.b32.xlu1 %v2267_v18, %s1907_s30 }
  0xe5   : > { %973 = vrot.lane.b32.xlu0 %v2184_v32, %s1906_s29 }
  0xe6   : > { %v2454_v27 = vpop.permute.xlu2 %805  ;;  %v786_v17 = vpop.permute.xlu1 %785 }
  0xe7   : > { %v2457_v22 = vsel %vm1080_vm4, %v1053_v14, %v786_v17  ;;  %v784_v58 = vpop.permute.xlu0 %783  ;;  %v821_v17 = vrot.slane %v819_v39, 1 }
  0xe8   : > { %v2461_v31 = vsel %vm1080_vm4, %v2325_v42, %v784_v58 }
  0xec   : > { %865 = vrot.lane.b32.xlu2 %v2204_v60, %s1905_s28  ;;  %838 = vrot.lane.b32.xlu1 %v2099_v13, %s1903_s26 }
  0xed   : > { %830 = vrot.lane.b32.xlu0 %v2014_v47, %s1903_s26 }
  0xee   : > { %v812_v8 = vpop.permute.xlu2 %811  ;;  %v792_v14 = vpop.permute.xlu1 %791 }
  0xef   : > { %v2470_v46 = vsel %vm1080_vm4, %v1079_v34, %v812_v8  ;;  %v2473_v50 = vsel %vm1080_vm4, %v1059_v21, %v792_v14  ;;  %v790_v3 = vpop.permute.xlu0 %789  ;;  %v822_v8 = vor.u32 %v821_v17, %v817_v5  ;;  %v341_v5 = vld [vmem:[%s1957_s22 + $0xd4] sm:$0x1] }
  0xf0   : > { %v2477_v42 = vsel %vm1080_vm4, %v2336_v19, %v790_v3  ;;  %v1282_v19 = vld [vmem:[%s2863_s1 + $0x10] sm:$0x3] }
  0xf4   : > { %910 = vrot.lane.b32.xlu2 %v2027_v59, %s1904_s27  ;;  %902 = vrot.lane.b32.xlu1 %v1994_v30, %s1904_s27  ;;  %v1292_v59 = vunpack.c.l.b16 %v1282_v19 }
  0xf5   : > { %873 = vrot.lane.b32.xlu0 %v2222_v11, %s1905_s28 }
  0xf6   : > { %v2485_v47 = vpop.permute.xlu2 %852  ;;  %v2487_v13 = vpop.permute.xlu1 %797  ;;  %v1295_v30 = vpack.c.b16 %v1292_v59, %v1292_v59 }
  0xf7   : > { %v796_v60 = vpop.permute.xlu0 %795 }
  0xf8   : > { %v2491_v21 = vsel %vm1080_vm4, %v2347_v36, %v796_v60  ;;  %v338_v36 = vld [vmem:[%s1957_s22 + $0xc8] sm:$0x1]  ;;  %v1333_v23 = vsel %vm1331_vm5, %v1295_v30, 0 }
  0xf9   : > { %1832 = vmatpush.bf16.msra.mxu2 %v1333_v23  ;;  %1833 = vmatpush.bf16.msra.mxu3 %v1333_v23  ;;  %v814_v9 = vunpack.c.l.b16 %v338_v36 }
  0xfa   : > { %1340 = vmatpush.bf16.msra.mxu0 %v1333_v23  ;;  %1831 = vmatpush.bf16.msra.mxu1 %v1333_v23 }
  0xfc   : > { %984 = vrot.lane.b32.xlu2 %v2201_v48, %s1907_s30  ;;  %957 = vrot.lane.b32.xlu1 %v2094_v6, %s1906_s29 }
  0xfd   : > { %949 = vrot.lane.b32.xlu0 %v2046_v15, %s1906_s29  ;;  %1835 = vmatpush.bf16.msra.mxu2 %v1830_v53 }
  0xfe   : > { %v2502_v11 = vpop.permute.xlu2 %916  ;;  %v804_v1 = vpop.permute.xlu1 %803  ;;  %1836 = vmatpush.bf16.msra.mxu3 %v1830_v53  ;;  %1341 = vmatpush.bf16.msra.mxu0 %v1830_v53 }
  0xff   : > { %v2506_v38 = vsel %vm1080_vm4, %v1071_v62, %v804_v1  ;;  %v802_v40 = vpop.permute.xlu0 %801  ;;  %v815_v62 = vpack.c.b16 %v814_v9, %v814_v9  ;;  %1834 = vmatpush.bf16.msra.mxu1 %v1830_v53  ;;  %v1106_v1 = vsel %vm1080_vm4, %v2429_v4, %v2454_v27 }
 0x100   : > { %v2510_v28 = vsel %vm1080_vm4, %v2360_v26, %v802_v40  ;;  %v1829_v26 = vld [vmem:[%s2863_s1] sm:$0xff]  ;;  %v1139_v40 = vsel %vm1113_vm6, %v1106_v1, %v2485_v47 }
 0x101   : > { %1838 = vmatpush.bf16.msra.mxu2 %v1829_v26  ;;  %v824_v58 = vshll.u32 %v815_v62, 16 }
 0x102   : > { %1839 = vmatpush.bf16.msra.mxu3 %v1829_v26  ;;  %1342 = vmatpush.bf16.msra.mxu0 %v1829_v26 }
 0x103   : > { %1837 = vmatpush.bf16.msra.mxu1 %v1829_v26 }
 0x104   : > { %856 = vrot.lane.b32.xlu2 %v2184_v32, %s1903_s26  ;;  %848 = vrot.lane.b32.xlu1 %v2126_v51, %s1903_s26 }
 0x105   : > { %992 = vrot.lane.b32.xlu0 %v2219_v10, %s1907_s30 }
 0x106   : > { %v972_v29 = vpop.permute.xlu2 %971  ;;  %v810_v7 = vpop.permute.xlu1 %809 }
 0x107   : > { %v2526_v32 = vsel %vm1080_vm4, %v1077_v61, %v810_v7  ;;  %v808_v34 = vpop.permute.xlu0 %807  ;;  %v826_v61 = vrot.slane %v824_v58, 1  ;;  %v933_v58 = vunpack.c.l.b16 %v341_v5  ;;  %v2876_v5 = vld [vmem:[#allocation2_spill] sm:$0xff] }
 0x108   : > { %v2530_v51 = vsel %vm1080_vm4, %v2374_v56, %v808_v34 }
 0x109   : > { %v2540_v60 = vsel %vm470_vm0, %v822_v8, %v826_v61 }
 0x10c   : > { %920 = vrot.lane.b32.xlu2 %v2121_v43, %s1904_s27  ;;  %891 = vrot.lane.b32.xlu1 %v2280_v63, %s1905_s28  ;;  %v860_v63 = vrot.slane %v2309_v24, 1 }
 0x10d   : > { %883 = vrot.lane.b32.xlu0 %v2267_v18, %s1905_s28  ;;  %v861_v18 = vrot.slane %v815_v62, 1 }
 0x10e   : > { %v837_v14 = vpop.permute.xlu2 %836  ;;  %v845_v3 = vpop.permute.xlu1 %844 }
 0x10f   : > { %v829_v56 = vpop.permute.xlu0 %828  ;;  %v2552_v30 = vsel %vm695_vm1, %v860_v63, %v861_v18 }
 0x110   : > { %v1115_v8 = vsel %vm1113_vm6, %v2389_v2, %v829_v56 }
 0x114   : > { %975 = vrot.lane.b32.xlu2 %v2540_v60, %s1906_s29  ;;  %967 = vrot.lane.b32.xlu1 %v2165_v57, %s1906_s29 }
 0x115   : > { %928 = vrot.lane.b32.xlu0 %v2309_v24, %s1904_s27 }
 0x116   : > { %v2548_v43 = vpop.permute.xlu2 %900  ;;  %v888_v19 = vpop.permute.xlu1 %887 }
 0x117   : > { %v880_v59 = vpop.permute.xlu0 %879  ;;  %v1172_v53 = vsel %vm1146_vm7, %v1139_v40, %v888_v19 }
 0x11c   : > { %832 = vrot.lane.b32.xlu2 %v2046_v15, %s1903_s26  ;;  %1010 = vrot.lane.b32.xlu1 %v2552_v30, %s1907_s30  ;;  %v1098_v15 = vsel %vm1080_vm4, %v2412_v35, %v2487_v13 }
 0x11d   : > { %1002 = vrot.lane.b32.xlu0 %v2264_v49, %s1907_s30  ;;  %v1131_v9 = vsel %vm1113_vm6, %v1098_v15, %v845_v3 }
 0x11e   : > { %v956_v36 = vpop.permute.xlu2 %955  ;;  %v964_v23 = vpop.permute.xlu1 %963  ;;  %v1164_v62 = vsel %vm1146_vm7, %v1131_v9, %v880_v59 }
 0x11f   : > { %v925_v24 = vpop.permute.xlu0 %924  ;;  %v1197_v4 = vsel %vm1179_vm8, %v1164_v62, %v2502_v11 }
 0x120   : > { %v1205_v39 = vsel %vm1179_vm8, %v1172_v53, %v925_v24  ;;  %v1230_v13 = vsel %vm1212_vm9, %v1197_v4, %v964_v23 }
 0x121   : > { %v1238_v47 = vsel %vm1212_vm9, %v1205_v39, %v972_v29 }
 0x124   : > { %875 = vrot.lane.b32.xlu2 %v2219_v10, %s1905_s28  ;;  %867 = vrot.lane.b32.xlu1 %v2201_v48, %s1905_s28 }
 0x125   : > { %840 = vrot.lane.b32.xlu0 %v2094_v6, %s1903_s26 }
 0x126   : > { %v2578_v35 = vpop.permute.xlu2 %846  ;;  %v1007_v27 = vpop.permute.xlu1 %1006 }
 0x127   : > { %v999_v26 = vpop.permute.xlu0 %998  ;;  %v1271_v10 = vsel %vm1245_vm10, %v1238_v47, %v1007_v27 }
 0x128   : > { %v1263_v48 = vsel %vm1245_vm10, %v1230_v13, %v999_v26  ;;  %1804 = vmatmul.msk.bf16.vlgmr.msra.gmra.mxu3 %vm1298_vm11, %v1271_v10 }
 0x129   : > { %1800 = vmatmul.msk.bf16.vlgmr.msra.gmra.mxu2 %vm1298_vm11, %v1263_v48 }
 0x12c   : > { %951 = vrot.lane.b32.xlu2 %v2004_v41, %s1906_s29  ;;  %912 = vrot.lane.b32.xlu1 %v2008_v45, %s1904_s27  ;;  %v1123_v45 = vsel %vm1113_vm6, %v2477_v42, %v837_v14  ;;  %v934_v14 = vpack.c.b16 %v933_v58, %v933_v58  ;;  %v2877_v58 = vld [vmem:[#allocation5_spill] sm:$0xff] }
 0x12d   : > { %904 = vrot.lane.b32.xlu0 %v1960_v0, %s1904_s27  ;;  %v1828_v0 = vld [vmem:[%s1957_s22 + $0xcc] sm:$0xff] }
 0x12e   : > { %v890_v6 = vpop.permute.xlu2 %889  ;;  %v872_v11 = vpop.permute.xlu1 %871  ;;  %v938_v18 = vshll.u32 %v1828_v0, 16  ;;  %v943_v1 = vshll.u32 %v934_v14, 16  ;;  %v980_v39 = vrot.slane %v934_v14, 1 }
 0x12f   : > { %v864_v29 = vpop.permute.xlu0 %863  ;;  %v1156_v61 = vsel %vm1146_vm7, %v1123_v45, %v872_v11 }
 0x130   : > { %v1148_v3 = vsel %vm1146_vm7, %v1115_v8, %v864_v29  ;;  %v1875_v29 = vld [vmem:[%s1957_s22 + $0x3c] sm:$0xff]  ;;  %s2730_s22 = scalar_lea.vmem %s2866_s4, %s1810_s19 }
 0x131   : > { %v1181_v2 = vsel %vm1179_vm8, %v1148_v3, %v2548_v43 }
 0x134   : > { %994 = vrot.lane.b32.xlu2 %v2246_v33, %s1907_s30  ;;  %986 = vrot.lane.b32.xlu1 %v2198_v44, %s1907_s30 }
 0x135   : > { %959 = vrot.lane.b32.xlu0 %v2084_v54, %s1906_s29 }
 0x136   : > { %v966_v7 = vpop.permute.xlu2 %965  ;;  %v948_v34 = vpop.permute.xlu1 %947 }
 0x137   : > { %v909_v17 = vpop.permute.xlu0 %908  ;;  %v1214_v59 = vsel %vm1212_vm9, %v1181_v2, %v948_v34  ;;  %v2875_v34 = vld [vmem:[#allocation3_spill] sm:$0xff] }
 0x138   : > { %v1189_v63 = vsel %vm1179_vm8, %v1156_v61, %v909_v17 }
 0x139   : > { %v1222_v19 = vsel %vm1212_vm9, %v1189_v63, %v956_v36  ;;  %v945_v36 = vrot.slane %v943_v1, 1 }
 0x13c   : > { %885 = vrot.lane.b32.xlu2 %v2264_v49, %s1905_s28  ;;  %858 = vrot.lane.b32.xlu1 %v2540_v60, %s1903_s26  ;;  %v940_v60 = vrot.slane %v938_v18, 1 }
 0x13d   : > { %850 = vrot.lane.b32.xlu0 %v2165_v57, %s1903_s26  ;;  %v936_v57 = vshrl.u32 %v1828_v0, 16 }
 0x13e   : > { %v1009_v42 = vpop.permute.xlu2 %1008  ;;  %v991_v56 = vpop.permute.xlu1 %990 }
 0x13f   : > { %v983_v23 = vpop.permute.xlu0 %982  ;;  %v1255_v49 = vsel %vm1245_vm10, %v1222_v19, %v991_v56  ;;  %v941_v43 = vor.u32 %v940_v60, %v936_v57 }
 0x140   : > { %v1247_v24 = vsel %vm1245_vm10, %v1214_v59, %v983_v23  ;;  %1796 = vmatmul.msk.bf16.vlgmr.msra.gmra.mxu1 %vm1298_vm11, %v1255_v49 }
 0x141   : > { %1792 = vmatmul.msk.bf16.vlgmr.msra.gmra.mxu0 %vm1298_vm11, %v1247_v24  ;;  %v946_v53 = vsel %vm470_vm0, %v941_v43, %v945_v36 }
 0x144   : > { %930 = vrot.lane.b32.xlu2 %v1828_v0, %s1904_s27  ;;  %922 = vrot.lane.b32.xlu1 %v2104_v20, %s1904_s27  ;;  %v979_v20 = vrot.slane %v1828_v0, 1 }
 0x145   : > { %893 = vrot.lane.b32.xlu0 %v2552_v30, %s1905_s28  ;;  %v1133_v30 = vsel %vm1113_vm6, %v2441_v37, %v2578_v35 }
 0x146   : > { %v882_v40 = vpop.permute.xlu1 %881  ;;  %v866_v15 = vpop.permute.xlu2 %865  ;;  %v981_v13 = vsel %vm695_vm1, %v979_v20, %v980_v39 }
 0x147   : > { %v855_v9 = vpop.permute.xlu0 %854  ;;  %v1166_v47 = vsel %vm1146_vm7, %v1133_v30, %v882_v40 }
 0x14c   : > { %1004 = vrot.lane.b32.xlu2 %v2261_v12, %s1907_s30  ;;  %977 = vrot.lane.b32.xlu1 %v946_v53, %s1906_s29  ;;  %v1141_v12 = vsel %vm1113_vm6, %v2530_v51, %v855_v9 }
 0x14d   : > { %969 = vrot.lane.b32.xlu0 %v2162_v55, %s1906_s29  ;;  %v1174_v55 = vsel %vm1146_vm7, %v1141_v12, %v890_v6 }
 0x14e   : > { %v927_v62 = vpop.permute.xlu1 %926  ;;  %v911_v27 = vpop.permute.xlu2 %910 }
 0x14f   : > { %v919_v4 = vpop.permute.xlu0 %918  ;;  %v1207_v10 = vsel %vm1179_vm8, %v1174_v55, %v927_v62 }
 0x150   : > { %v1199_v26 = vsel %vm1179_vm8, %v1166_v47, %v919_v4 }
 0x151   : > { %v1232_v35 = vsel %vm1212_vm9, %v1199_v26, %v966_v7 }
 0x154   : > { %842 = vrot.lane.b32.xlu2 %v2084_v54, %s1903_s26  ;;  %834 = vrot.lane.b32.xlu1 %v2004_v41, %s1903_s26 }
 0x155   : > { %1012 = vrot.lane.b32.xlu0 %v981_v13, %s1907_s30 }
 0x156   : > { %v1001_v37 = vpop.permute.xlu1 %1000  ;;  %v985_v41 = vpop.permute.xlu2 %984 }
 0x157   : > { %v974_v48 = vpop.permute.xlu0 %973  ;;  %v1265_v51 = vsel %vm1245_vm10, %v1232_v35, %v1001_v37 }
 0x158   : > { %v1240_v11 = vsel %vm1212_vm9, %v1207_v10, %v974_v48  ;;  %1801 = vmatmul.msk.bf16.gmra.mxu2 %vm1298_vm11, %v1265_v51 }
 0x159   : > { %v1273_v54 = vsel %vm1245_vm10, %v1240_v11, %v1009_v42 }
 0x15a   : > { %1805 = vmatmul.msk.bf16.gmra.mxu3 %vm1298_vm11, %v1273_v54 }
 0x15c   : > { %906 = vrot.lane.b32.xlu2 %v1875_v29, %s1904_s27  ;;  %877 = vrot.lane.b32.xlu1 %v2246_v33, %s1905_s28 }
 0x15d   : > { %869 = vrot.lane.b32.xlu0 %v2198_v44, %s1905_s28  ;;  %v2878_v44 = vld [vmem:[#allocation4_spill] sm:$0xff] }
 0x15e   : > { %v839_v6 = vpop.permute.xlu1 %838  ;;  %v857_v17 = vpop.permute.xlu2 %856 }
 0x15f   : > { %v831_v7 = vpop.permute.xlu0 %830  ;;  %v1143_v43 = vsel %vm1113_vm6, %v2526_v32, %v857_v17 }
 0x160   : > { %v1117_v33 = vsel %vm1113_vm6, %v2461_v31, %v831_v7  ;;  %v1125_v31 = vsel %vm1113_vm6, %v2473_v50, %v839_v6 }
 0x161   : > { %v1150_v8 = vsel %vm1146_vm7, %v1117_v33, %v866_v15 }
 0x164   : > { %961 = vrot.lane.b32.xlu2 %v2875_v34, %s1906_s29  ;;  %953 = vrot.lane.b32.xlu1 %v2876_v5, %s1906_s29  ;;  %v2721_v34 = vld [vmem:[%s2865_s3] ss:$0 sm:$0xff] }
 0x165   : > { %914 = vrot.lane.b32.xlu0 %v2080_v52, %s1904_s27 }
 0x166   : > { %v903_v45 = vpop.permute.xlu1 %902  ;;  %v921_v3 = vpop.permute.xlu2 %920 }
 0x167   : > { %v874_v0 = vpop.permute.xlu0 %873  ;;  %v1183_v63 = vsel %vm1179_vm8, %v1150_v8, %v903_v45 }
 0x168   : > { %v1158_v18 = vsel %vm1146_vm7, %v1125_v31, %v874_v0 }
 0x169   : > { %v1191_v2 = vsel %vm1179_vm8, %v1158_v18, %v911_v27 }
 0x16c   : > { %996 = vrot.lane.b32.xlu1 %v2877_v58, %s1907_s30 }
 0x16d   : > { %988 = vrot.lane.b32.xlu0 %v2878_v44, %s1907_s30 }
 0x16e   : > { %v958_v61 = vpop.permute.xlu1 %957  ;;  %v976_v49 = vpop.permute.xlu2 %975 }
 0x16f   : > { %v950_v42 = vpop.permute.xlu0 %949  ;;  %v1224_v19 = vsel %vm1212_vm9, %v1191_v2, %v958_v61 }
 0x170   : > { %v1216_v52 = vsel %vm1212_vm9, %v1183_v63, %v950_v42 }
 0x171   : > { %v1249_v14 = vsel %vm1245_vm10, %v1216_v52, %v985_v41 }
 0x172   : > { %1793 = vmatmul.msk.bf16.gmra.mxu0 %vm1298_vm11, %v1249_v14 }
 0x176   : > { %v849_v56 = vpop.permute.xlu1 %848  ;;  %v833_v60 = vpop.permute.xlu2 %832 }
 0x177   : > { %v993_v59 = vpop.permute.xlu0 %992  ;;  %v1135_v36 = vsel %vm1113_vm6, %v2510_v28, %v849_v56  ;;  %v1119_v55 = vsel %vm1113_vm6, %v2457_v22, %v833_v60 }
 0x178   : > { %v1257_v23 = vsel %vm1245_vm10, %v1224_v19, %v993_v59 }
 0x179   : > { %1797 = vmatmul.msk.bf16.gmra.mxu1 %vm1298_vm11, %v1257_v23 }
 0x17e   : > { %v892_v24 = vpop.permute.xlu1 %891  ;;  %v876_v53 = vpop.permute.xlu2 %875 }
 0x17f   : > { %v884_v57 = vpop.permute.xlu0 %883  ;;  %v1176_v40 = vsel %vm1146_vm7, %v1143_v43, %v892_v24 }
 0x180   : > { %v1168_v15 = vsel %vm1146_vm7, %v1135_v36, %v884_v57 }
 0x181   : > { %v1201_v62 = vsel %vm1179_vm8, %v1168_v15, %v921_v3 }
 0x186   : > { %v968_v1 = vpop.permute.xlu1 %967  ;;  %v952_v47 = vpop.permute.xlu2 %951 }
 0x187   : > { %v929_v50 = vpop.permute.xlu0 %928  ;;  %v1234_v4 = vsel %vm1212_vm9, %v1201_v62, %v968_v1 }
 0x188   : > { %v1209_v9 = vsel %vm1179_vm8, %v1176_v40, %v929_v50 }
 0x189   : > { %v1242_v39 = vsel %vm1212_vm9, %v1209_v9, %v976_v49 }
 0x18e   : > { %v1011_v20 = vpop.permute.xlu1 %1010  ;;  %v995_v37 = vpop.permute.xlu2 %994 }
 0x18f   : > { %v1003_v30 = vpop.permute.xlu0 %1002  ;;  %v1275_v32 = vsel %vm1245_vm10, %v1242_v39, %v1011_v20 }
 0x190   : > { %v1267_v27 = vsel %vm1245_vm10, %v1234_v4, %v1003_v30  ;;  %1806 = vmatmul.msk.bf16.gmra.mxu3 %vm1298_vm11, %v1275_v32 }
 0x191   : > { %1802 = vmatmul.msk.bf16.gmra.mxu2 %vm1298_vm11, %v1267_v27 }
 0x196   : > { %v868_v28 = vpop.permute.xlu1 %867  ;;  %v886_v5 = vpop.permute.xlu2 %885 }
 0x197   : > { %v841_v13 = vpop.permute.xlu0 %840  ;;  %v1152_v35 = vsel %vm1146_vm7, %v1119_v55, %v868_v28 }
 0x198   : > { %v1127_v10 = vsel %vm1113_vm6, %v2423_v25, %v841_v13  ;;  %v2714_v25 = vld [vmem:[%s2864_s2] ss:$0 sm:$0xff] }
 0x199   : > { %v1160_v51 = vsel %vm1146_vm7, %v1127_v10, %v876_v53 }
 0x19e   : > { %v913_v12 = vpop.permute.xlu1 %912  ;;  %v931_v31 = vpop.permute.xlu2 %930 }
 0x19f   : > { %v905_v26 = vpop.permute.xlu0 %904  ;;  %v1193_v41 = vsel %vm1179_vm8, %v1160_v51, %v913_v12 }
 0x1a0   : > { %v1185_v48 = vsel %vm1179_vm8, %v1152_v35, %v905_v26 }
 0x1a1   : > { %v1218_v54 = vsel %vm1212_vm9, %v1185_v48, %v952_v47 }
 0x1a6   : > { %v987_v11 = vpop.permute.xlu1 %986  ;;  %v1005_v36 = vpop.permute.xlu2 %1004 }
 0x1a7   : > { %v960_v29 = vpop.permute.xlu0 %959  ;;  %v1251_v6 = vsel %vm1245_vm10, %v1218_v54, %v987_v11 }
 0x1a8   : > { %v1226_v22 = vsel %vm1212_vm9, %v1193_v41, %v960_v29  ;;  %1794 = vmatmul.msk.bf16.gmra.mxu0 %vm1298_vm11, %v1251_v6 }
 0x1a9   : > { %v1259_v7 = vsel %vm1245_vm10, %v1226_v22, %v995_v37 }
 0x1aa   : > { %1798 = vmatmul.msk.bf16.gmra.mxu1 %vm1298_vm11, %v1259_v7 }
 0x1ab   : > { %v1404_v17 = vpop.f32.mrf.mxu3 }
 0x1ac   : > { %v1384_v45 = vpop.f32.mrf.mxu2  ;;  %v1452_v0 = vmul.f32 %v2714_v25, %v1404_v17 }
 0x1ad   : > { %v1444_v33 = vmul.f32 %v2714_v25, %v1384_v45 }
 0x1ae   : > { %v1488_v58 = vadd.f32 %v2721_v34, %v1452_v0  ;;  %v859_v44 = vpop.permute.xlu1 %858  ;;  %v843_v10 = vpop.permute.xlu2 %842 }
 0x1af   : > { %v1480_v8 = vadd.f32 %v2721_v34, %v1444_v33  ;;  %v851_v61 = vpop.permute.xlu0 %850  ;;  %v1145_v39 = vsel %vm1113_vm6, %v2470_v46, %v859_v44  ;;  %v1129_v7 = vsel %vm1113_vm6, %v2491_v21, %v843_v10 }
 0x1b0   : > { %v1520_v3 = vmax.f32 %v1488_v58, 0.0  ;;  %v1137_v24 = vsel %vm1113_vm6, %v2506_v38, %v851_v61 }
 0x1b1   : > { %v1512_v63 = vmax.f32 %v1480_v8, 0.0  ;;  %v1170_v60 = vsel %vm1146_vm7, %v1137_v24, %v886_v5 }
 0x1b2   : > { %1552 = vst [vmem:[%s2730_s22 + $0xc0] sm:$0xff] %v1520_v3 }
 0x1b3   : > { %1544 = vst [vmem:[%s2730_s22 + $0x80] sm:$0xff] %v1512_v63  ;;  %v1406_v42 = vpop.f32.mrf.mxu3 }
 0x1b4   : > { %v1386_v52 = vpop.f32.mrf.mxu2  ;;  %v1453_v14 = vmul.f32 %v2714_v25, %v1406_v42 }
 0x1b5   : > { %v1445_v18 = vmul.f32 %v2714_v25, %v1386_v52 }
 0x1b6   : > { %v1489_v2 = vadd.f32 %v2721_v34, %v1453_v14  ;;  %v923_v56 = vpop.permute.xlu1 %922  ;;  %v907_v29 = vpop.permute.xlu2 %906 }
 0x1b7   : > { %v1481_v19 = vadd.f32 %v2721_v34, %v1445_v18  ;;  %v894_v59 = vpop.permute.xlu0 %893  ;;  %v1203_v40 = vsel %vm1179_vm8, %v1170_v60, %v923_v56 }
 0x1b8   : > { %v1521_v23 = vmax.f32 %v1489_v2, 0.0  ;;  %v1178_v30 = vsel %vm1146_vm7, %v1145_v39, %v894_v59 }
 0x1b9   : > { %v1513_v49 = vmax.f32 %v1481_v19, 0.0  ;;  %v1211_v28 = vsel %vm1179_vm8, %v1178_v30, %v931_v31 }
 0x1ba   : > { %1553 = vst [vmem:[%s2730_s22 + $0xc8] sm:$0xff] %v1521_v23 }
 0x1bb   : > { %1545 = vst [vmem:[%s2730_s22 + $0x88] sm:$0xff] %v1513_v49 }
 0x1bd   : > { %v1364_v57 = vpop.f32.mrf.mxu1 }
 0x1be   : > { %v1344_v1 = vpop.f32.mrf.mxu0  ;;  %v1436_v50 = vmul.f32 %v2714_v25, %v1364_v57  ;;  %v978_v43 = vpop.permute.xlu1 %977 }
 0x1bf   : > { %v1428_v15 = vmul.f32 %v2714_v25, %v1344_v1  ;;  %v970_v9 = vpop.permute.xlu0 %969  ;;  %v1244_v26 = vsel %vm1212_vm9, %v1211_v28, %v978_v43  ;;  %v962_v33 = vpop.permute.xlu2 %961 }
 0x1c0   : > { %v1472_v53 = vadd.f32 %v2721_v34, %v1436_v50  ;;  %v1236_v38 = vsel %vm1212_vm9, %v1203_v40, %v970_v9 }
 0x1c1   : > { %v1464_v62 = vadd.f32 %v2721_v34, %v1428_v15  ;;  %v1269_v20 = vsel %vm1245_vm10, %v1236_v38, %v1005_v36 }
 0x1c2   : > { %v1504_v4 = vmax.f32 %v1472_v53, 0.0  ;;  %1803 = vmatmul.msk.bf16.gmra.mxu2 %vm1298_vm11, %v1269_v20 }
 0x1c3   : > { %v1496_v32 = vmax.f32 %v1464_v62, 0.0 }
 0x1c4   : > { %1536 = vst [vmem:[%s2730_s22 + $0x40] sm:$0xff] %v1504_v4 }
 0x1c5   : > { %1528 = vst [vmem:[%s2730_s22] sm:$0xff] %v1496_v32  ;;  %v1366_v27 = vpop.f32.mrf.mxu1 }
 0x1c6   : > { %v1346_v47 = vpop.f32.mrf.mxu0  ;;  %v1437_v13 = vmul.f32 %v2714_v25, %v1366_v27  ;;  %v835_v12 = vpop.permute.xlu1 %834 }
 0x1c7   : > { %v1429_v46 = vmul.f32 %v2714_v25, %v1346_v47  ;;  %v1013_v55 = vpop.permute.xlu0 %1012  ;;  %v1121_v5 = vsel %vm1113_vm6, %v2405_v16, %v835_v12 }
 0x1c8   : > { %v1473_v37 = vadd.f32 %v2721_v34, %v1437_v13  ;;  %v1277_v35 = vsel %vm1245_vm10, %v1244_v26, %v1013_v55 }
 0x1c9   : > { %v1465_v48 = vadd.f32 %v2721_v34, %v1429_v46  ;;  %1807 = vmatmul.msk.bf16.gmra.mxu3 %vm1298_vm11, %v1277_v35 }
 0x1ca   : > { %v1505_v51 = vmax.f32 %v1473_v37, 0.0 }
 0x1cb   : > { %v1497_v11 = vmax.f32 %v1465_v48, 0.0 }
 0x1cc   : > { %1537 = vst [vmem:[%s2730_s22 + $0x48] sm:$0xff] %v1505_v51 }
 0x1cd   : > { %1529 = vst [vmem:[%s2730_s22 + $0x8] sm:$0xff] %v1497_v11 }
 0x1ce   : > { %v878_v54 = vpop.permute.xlu1 %877 }
 0x1cf   : > { %v870_v41 = vpop.permute.xlu0 %869  ;;  %v1162_v17 = vsel %vm1146_vm7, %v1129_v7, %v878_v54 }
 0x1d0   : > { %v1154_v45 = vsel %vm1146_vm7, %v1121_v5, %v870_v41 }
 0x1d1   : > { %v1187_v61 = vsel %vm1179_vm8, %v1154_v45, %v907_v29 }
 0x1d6   : > { %v954_v6 = vpop.permute.xlu1 %953 }
 0x1d7   : > { %v915_v22 = vpop.permute.xlu0 %914  ;;  %v1220_v42 = vsel %vm1212_vm9, %v1187_v61, %v954_v6 }
 0x1d8   : > { %v1195_v0 = vsel %vm1179_vm8, %v1162_v17, %v915_v22 }
 0x1d9   : > { %v1228_v21 = vsel %vm1212_vm9, %v1195_v0, %v962_v33 }
 0x1db   : > { %v1389_v58 = vpop.f32.mrf.mxu2 }
 0x1dc   : > { %v1446_v44 = vmul.f32 %v2714_v25, %v1389_v58 }
 0x1dd   : > { %v1409_v8 = vpop.f32.mrf.mxu3 }
 0x1de   : > { %v1482_v3 = vadd.f32 %v2721_v34, %v1446_v44  ;;  %v1454_v16 = vmul.f32 %v2714_v25, %v1409_v8  ;;  %v997_v63 = vpop.permute.xlu1 %996 }
 0x1df   : > { %v989_v52 = vpop.permute.xlu0 %988  ;;  %v1261_v14 = vsel %vm1245_vm10, %v1228_v21, %v997_v63 }
 0x1e0   : > { %v1514_v31 = vmax.f32 %v1482_v3, 0.0  ;;  %v1490_v18 = vadd.f32 %v2721_v34, %v1454_v16  ;;  %v1253_v2 = vsel %vm1245_vm10, %v1220_v42, %v989_v52  ;;  %1799 = vmatmul.msk.bf16.gmra.mxu1 %vm1298_vm11, %v1261_v14 }
 0x1e1   : > { %1795 = vmatmul.msk.bf16.gmra.mxu0 %vm1298_vm11, %v1253_v2 }
 0x1e2   : > { %1546 = vst [vmem:[%s2730_s22 + $0x90] sm:$0xff] %v1514_v31  ;;  %v1522_v56 = vmax.f32 %v1490_v18, 0.0 }
 0x1e3   : > { %v1391_v19 = vpop.f32.mrf.mxu2 }
 0x1e4   : > { %1554 = vst [vmem:[%s2730_s22 + $0xd0] sm:$0xff] %v1522_v56  ;;  %v1447_v59 = vmul.f32 %v2714_v25, %v1391_v19 }
 0x1e5   : > { %v1411_v23 = vpop.f32.mrf.mxu3 }
 0x1e6   : > { %v1483_v49 = vadd.f32 %v2721_v34, %v1447_v59  ;;  %v1455_v24 = vmul.f32 %v2714_v25, %v1411_v23 }
 0x1e8   : > { %v1515_v57 = vmax.f32 %v1483_v49, 0.0  ;;  %v1491_v60 = vadd.f32 %v2721_v34, %v1455_v24 }
 0x1ea   : > { %1547 = vst [vmem:[%s2730_s22 + $0x98] sm:$0xff] %v1515_v57  ;;  %v1523_v1 = vmax.f32 %v1491_v60, 0.0 }
 0x1ec   : > { %1555 = vst [vmem:[%s2730_s22 + $0xd8] sm:$0xff] %v1523_v1 }
 0x1ef   : > { %v1349_v50 = vpop.f32.mrf.mxu0 }
 0x1f0   : > { %v1430_v43 = vmul.f32 %v2714_v25, %v1349_v50 }
 0x1f2   : > { %v1466_v36 = vadd.f32 %v2721_v34, %v1430_v43 }
 0x1f4   : > { %v1498_v40 = vmax.f32 %v1466_v36, 0.0 }
 0x1f6   : > { %1530 = vst [vmem:[%s2730_s22 + $0x10] sm:$0xff] %v1498_v40  ;;  %v1369_v15 = vpop.f32.mrf.mxu1 }
 0x1f7   : > { %v1438_v9 = vmul.f32 %v2714_v25, %v1369_v15  ;;  %v1351_v53 = vpop.f32.mrf.mxu0 }
 0x1f8   : > { %v1431_v38 = vmul.f32 %v2714_v25, %v1351_v53 }
 0x1f9   : > { %v1474_v62 = vadd.f32 %v2721_v34, %v1438_v9 }
 0x1fa   : > { %v1467_v20 = vadd.f32 %v2721_v34, %v1431_v38 }
 0x1fb   : > { %v1506_v39 = vmax.f32 %v1474_v62, 0.0 }
 0x1fc   : > { %v1499_v4 = vmax.f32 %v1467_v20, 0.0 }
 0x1fd   : > { %1538 = vst [vmem:[%s2730_s22 + $0x50] sm:$0xff] %v1506_v39 }
 0x1fe   : > { %1531 = vst [vmem:[%s2730_s22 + $0x18] sm:$0xff] %v1499_v4  ;;  %v1371_v30 = vpop.f32.mrf.mxu1 }
 0x1ff   : > { %v1439_v32 = vmul.f32 %v2714_v25, %v1371_v30 }
 0x201   : > { %v1475_v27 = vadd.f32 %v2721_v34, %v1439_v32 }
 0x203   : > { %v1507_v28 = vmax.f32 %v1475_v27, 0.0 }
 0x205   : > { %1539 = vst [vmem:[%s2730_s22 + $0x58] sm:$0xff] %v1507_v28 }
 0x213   : > { %v1414_v47 = vpop.f32.mrf.mxu3 }
 0x214   : > { %v1394_v13 = vpop.f32.mrf.mxu2  ;;  %v1456_v12 = vmul.f32 %v2714_v25, %v1414_v47 }
 0x215   : > { %v1448_v26 = vmul.f32 %v2714_v25, %v1394_v13 }
 0x216   : > { %v1492_v46 = vadd.f32 %v2721_v34, %v1456_v12 }
 0x217   : > { %v1484_v55 = vadd.f32 %v2721_v34, %v1448_v26 }
 0x218   : > { %v1524_v37 = vmax.f32 %v1492_v46, 0.0 }
 0x219   : > { %v1516_v35 = vmax.f32 %v1484_v55, 0.0 }
 0x21a   : > { %1556 = vst [vmem:[%s2730_s22 + $0xe0] sm:$0xff] %v1524_v37 }
 0x21b   : > { %1548 = vst [vmem:[%s2730_s22 + $0xa0] sm:$0xff] %v1516_v35  ;;  %v1416_v10 = vpop.f32.mrf.mxu3 }
 0x21c   : > { %v1396_v48 = vpop.f32.mrf.mxu2  ;;  %v1457_v51 = vmul.f32 %v2714_v25, %v1416_v10 }
 0x21d   : > { %v1449_v11 = vmul.f32 %v2714_v25, %v1396_v48 }
 0x21e   : > { %v1493_v54 = vadd.f32 %v2721_v34, %v1457_v51 }
 0x21f   : > { %v1485_v41 = vadd.f32 %v2721_v34, %v1449_v11 }
 0x220   : > { %v1525_v29 = vmax.f32 %v1493_v54, 0.0 }
 0x221   : > { %v1517_v6 = vmax.f32 %v1485_v41, 0.0 }
 0x222   : > { %1557 = vst [vmem:[%s2730_s22 + $0xe8] sm:$0xff] %v1525_v29 }
 0x223   : > { %1549 = vst [vmem:[%s2730_s22 + $0xa8] sm:$0xff] %v1517_v6 }
 0x225   : > { %v1354_v22 = vpop.f32.mrf.mxu0 }
 0x226   : > { %v1432_v7 = vmul.f32 %v2714_v25, %v1354_v22 }
 0x227   : > { %v1374_v5 = vpop.f32.mrf.mxu1 }
 0x228   : > { %v1468_v17 = vadd.f32 %v2721_v34, %v1432_v7  ;;  %v1440_v45 = vmul.f32 %v2714_v25, %v1374_v5 }
 0x22a   : > { %v1500_v0 = vmax.f32 %v1468_v17, 0.0  ;;  %v1476_v33 = vadd.f32 %v2721_v34, %v1440_v45 }
 0x22c   : > { %1532 = vst [vmem:[%s2730_s22 + $0x20] sm:$0xff] %v1500_v0  ;;  %v1508_v58 = vmax.f32 %v1476_v33, 0.0 }
 0x22d   : > { %v1356_v44 = vpop.f32.mrf.mxu0 }
 0x22e   : > { %1540 = vst [vmem:[%s2730_s22 + $0x60] sm:$0xff] %v1508_v58  ;;  %v1433_v8 = vmul.f32 %v2714_v25, %v1356_v44 }
 0x22f   : > { %v1376_v61 = vpop.f32.mrf.mxu1 }
 0x230   : > { %v1469_v21 = vadd.f32 %v2721_v34, %v1433_v8  ;;  %v1441_v3 = vmul.f32 %v2714_v25, %v1376_v61 }
 0x232   : > { %v1501_v16 = vmax.f32 %v1469_v21, 0.0  ;;  %v1477_v63 = vadd.f32 %v2721_v34, %v1441_v3 }
 0x234   : > { %1533 = vst [vmem:[%s2730_s22 + $0x28] sm:$0xff] %v1501_v16  ;;  %v1509_v42 = vmax.f32 %v1477_v63, 0.0 }
 0x236   : > { %1541 = vst [vmem:[%s2730_s22 + $0x68] sm:$0xff] %v1509_v42 }
 0x245   : > { %v1399_v52 = vpop.f32.mrf.mxu2 }
 0x246   : > { %v1450_v14 = vmul.f32 %v2714_v25, %v1399_v52 }
 0x248   : > { %v1486_v31 = vadd.f32 %v2721_v34, %v1450_v14 }
 0x24a   : > { %v1518_v18 = vmax.f32 %v1486_v31, 0.0 }
 0x24c   : > { %1550 = vst [vmem:[%s2730_s22 + $0xb0] sm:$0xff] %v1518_v18  ;;  %v1419_v2 = vpop.f32.mrf.mxu3 }
 0x24d   : > { %v1458_v56 = vmul.f32 %v2714_v25, %v1419_v2  ;;  %v1401_v19 = vpop.f32.mrf.mxu2 }
 0x24e   : > { %v1451_v59 = vmul.f32 %v2714_v25, %v1401_v19 }
 0x24f   : > { %v1494_v23 = vadd.f32 %v2721_v34, %v1458_v56 }
 0x250   : > { %v1487_v49 = vadd.f32 %v2721_v34, %v1451_v59 }
 0x251   : > { %v1526_v24 = vmax.f32 %v1494_v23, 0.0 }
 0x252   : > { %v1519_v57 = vmax.f32 %v1487_v49, 0.0 }
 0x253   : > { %1558 = vst [vmem:[%s2730_s22 + $0xf0] sm:$0xff] %v1526_v24 }
 0x254   : > { %1551 = vst [vmem:[%s2730_s22 + $0xb8] sm:$0xff] %v1519_v57  ;;  %v1421_v60 = vpop.f32.mrf.mxu3 }
 0x255   : > { %v1459_v1 = vmul.f32 %v2714_v25, %v1421_v60 }
 0x257   : > { %v1495_v50 = vadd.f32 %v2721_v34, %v1459_v1 }
 0x259   : > { %v1527_v43 = vmax.f32 %v1495_v50, 0.0 }
 0x25b   : > { %1559 = vst [vmem:[%s2730_s22 + $0xf8] sm:$0xff] %v1527_v43 }
 0x25d   : > { %v1379_v36 = vpop.f32.mrf.mxu1 }
 0x25e   : > { %v1359_v40 = vpop.f32.mrf.mxu0  ;;  %v1442_v15 = vmul.f32 %v2714_v25, %v1379_v36 }
 0x25f   : > { %v1434_v9 = vmul.f32 %v2714_v25, %v1359_v40 }
 0x260   : > { %v1478_v53 = vadd.f32 %v2721_v34, %v1442_v15 }
 0x261   : > { %v1470_v38 = vadd.f32 %v2721_v34, %v1434_v9 }
 0x262   : > { %v1510_v62 = vmax.f32 %v1478_v53, 0.0 }
 0x263   : > { %v1502_v20 = vmax.f32 %v1470_v38, 0.0 }
 0x264   : > { %1542 = vst [vmem:[%s2730_s22 + $0x70] sm:$0xff] %v1510_v62 }
 0x265   : > { %1534 = vst [vmem:[%s2730_s22 + $0x30] sm:$0xff] %v1502_v20  ;;  %v1381_v39 = vpop.f32.mrf.mxu1 }
 0x266   : > { %v1361_v4 = vpop.f32.mrf.mxu0  ;;  %v1443_v30 = vmul.f32 %v2714_v25, %v1381_v39 }
 0x267   : > { %v1435_v32 = vmul.f32 %v2714_v25, %v1361_v4 }
 0x268   : > { %v1479_v27 = vadd.f32 %v2721_v34, %v1443_v30 }
 0x269   : > { %v1471_v28 = vadd.f32 %v2721_v34, %v1435_v32 }
 0x26a   : > { %v1511_v47 = vmax.f32 %v1479_v27, 0.0 }
 0x26b   : > { %v1503_v13 = vmax.f32 %v1471_v28, 0.0 }
 0x26c   : > { %1543 = vst [vmem:[%s2730_s22 + $0x78] sm:$0xff] %v1511_v47 }
 0x26d   : > { %1535 = vst [vmem:[%s2730_s22 + $0x38] sm:$0xff] %v1503_v13 }
 0x26e PF: > { %s14_s17 = sadd.s32 1, %s1898_s17   ;;  %s2879_s15 = smov %s1894_s16 }
 0x26f   : > { %p11_p5 = scmp.ge.s32.totalorder %s14_s17, 4   ;;  %s2880_s16 = smov %s2882_s18 }
 0x271   :  { %13 = sbr.rel (!%p11_p5) target bundleno = 2 (0x2), region = 76 }

</bundles_post_ra>
